<compile_context>
chip_gen: v5e
topology: v5e:2x2
jax: 0.10.0
libtpu: 0.0.40
codegen_flags: <defaults>
</compile_context>

<pallas_src>
import numpy as np
import jax
import jax.numpy as jnp
from jax.experimental import pallas as pl
from jax.experimental.pallas import tpu as pltpu

NUM_LEVELS = 3
KERNEL_SIZE = 5
SIGMA = 1.0
PAD = KERNEL_SIZE // 2
CHARB_EPS = 1e-6            # matches L1_Charbonnier_loss (eps added un-squared inside sqrt)

_BLOCK_BUDGET_BYTES = 4 << 20    # per plane-block budget (working set is ~6-10x this)
_VMEM_LIMIT_BYTES = 48 << 20     # above the 16/32 MiB scoped defaults, below v7x's 64 MiB


# --------------------------- constant filter matrices ------------------------

def _gaussian_taps_1d(kernel_size, sigma):
    # The reference 2-D kernel exp(-(xx^2+yy^2)/(2s^2))/sum is exactly the outer
    # product of these normalized 1-D taps.
    ax = np.arange(-kernel_size // 2 + 1.0, kernel_size // 2 + 1.0)
    k = np.exp(-(ax ** 2) / (2.0 * sigma ** 2))
    return (k / k.sum()).astype(np.float64)


_K1D = _gaussian_taps_1d(KERNEL_SIZE, SIGMA)


def _blur_matrix(n):
    """Band matrix B (n, n): (B @ z) = 5-tap Gaussian along rows with zero padding."""
    B = np.zeros((n, n), dtype=np.float64)
    for i in range(n):
        for dy in range(KERNEL_SIZE):
            r = i + dy - PAD
            if 0 <= r < n:
                B[i, r] += _K1D[dy]
    return B


def _resize_matrix(in_size, out_size):
    """R (out, in): out = R @ in along one axis; PyTorch bilinear, align_corners=False."""
    R = np.zeros((out_size, in_size), dtype=np.float64)
    for d in range(out_size):
        src = (d + 0.5) * (in_size / out_size) - 0.5
        src = max(src, 0.0)                     # PyTorch clamps negative source coords
        i0 = min(int(np.floor(src)), in_size - 1)
        i1 = min(i0 + 1, in_size - 1)
        frac = src - i0
        R[d, i0] += 1.0 - frac
        R[d, i1] += frac
    return R


def _blur_down_matrices(h, w, h2, w2):
    """Composite matrices: down(blur(x)) = Av @ x @ Ah  (Av: (h2,h), Ah: (w,w2))."""
    Bv = _blur_matrix(h)                 # rows (left-multiply)
    Bh = _blur_matrix(w).T               # cols (right-multiply)
    Dv = _resize_matrix(h, h2)           # (h2, h)
    Dh = _resize_matrix(w, w2)           # (w2, w)
    Av = Dv @ Bv                         # (h2, h)
    Ah = Bh @ Dh.T                       # (w, w2)
    return jnp.asarray(Ah, jnp.float32), jnp.asarray(Av, jnp.float32)


def _lap_matrices(h, w, hh, wh):
    """Composite matrices: blur(upsample(z)) = Cv @ z @ Ch  (Cv: (h,hh), Ch: (wh,w))."""
    Bv = _blur_matrix(h)
    Bh = _blur_matrix(w).T
    Uv = _resize_matrix(hh, h)           # (h, hh)
    Uh = _resize_matrix(wh, w)           # (w, wh)
    Cv = Bv @ Uv                         # (h, hh)
    Ch = Uh.T @ Bh                       # (wh, w)
    return jnp.asarray(Ch, jnp.float32), jnp.asarray(Cv, jnp.float32)


# --------------------------- Pallas kernels ----------------------------------

def _apply_sep_matrices(x, mat_h, mat_v):
    """x: (p, a, b);  mat_h: (b, b2);  mat_v: (a2, a)  ->  (p, a2, b2).

    Both contractions are batched MXU matmuls (flash-attention style einsums);
    the tiny per-axis matrices are broadcast over the plane-block axis.
    """
    p = x.shape[0]
    mh = jnp.broadcast_to(mat_h[None], (p,) + mat_h.shape)
    mv = jnp.broadcast_to(mat_v[None], (p,) + mat_v.shape)
    y = jnp.einsum('phw,pwv->phv', x, mh, preferred_element_type=jnp.float32)
    return jnp.einsum('psh,phv->psv', mv, y, preferred_element_type=jnp.float32)


def _blur_down_kernel(x_ref, ah_ref, av_ref, o_ref):
    """Fused depthwise 5x5 Gaussian blur + x0.5 bilinear downsample (MXU matmuls)."""
    x = x_ref[...].astype(jnp.float32)
    o_ref[...] = _apply_sep_matrices(x, ah_ref[...], av_ref[...]).astype(o_ref.dtype)


def _lap_charb_kernel(cp_ref, ct_ref, hp_ref, ht_ref, ch_ref, cv_ref, o_ref):
    """Fused (upsample + blur + Laplacian residual + Charbonnier) partial sum.

    cp/ct: full-res pred/target blocks of gp[i];  hp/ht: HALF-res blocks of gp[i+1].
    Uses linearity:  lp_pred - lp_targ = (cp - ct) - blur(up(hp - ht)).
    o_ref is a lane-dense (1, 8, 128) accumulator, resident across the trailing
    ("arbitrary") grid axis; one accumulator block per "parallel" core-slot.
    """
    @pl.when(pl.program_id(1) == 0)     # init keyed on the reduction axis
    def _():
        o_ref[...] = jnp.zeros_like(o_ref)

    dc = cp_ref[...].astype(jnp.float32) - ct_ref[...].astype(jnp.float32)
    dn = hp_ref[...].astype(jnp.float32) - ht_ref[...].astype(jnp.float32)
    blur_up = _apply_sep_matrices(dn, ch_ref[...], cv_ref[...])
    d = dc - blur_up
    partial = jnp.sum(jnp.sqrt(d * d + CHARB_EPS))
    o_ref[...] = o_ref[...] + partial   # broadcast scalar over the (1,8,128) tile


# --------------------------- wrappers -----------------------------------------

def _choose_pblk(nplanes, plane_bytes, budget_bytes, even_blocks=False, min_blocks=1):
    """Largest divisor of nplanes whose block fits the budget (prefer >=min_blocks
    blocks, and an even block count when requested, so megacore has work)."""
    divisors = [d for d in range(1, nplanes + 1) if nplanes % d == 0]
    fitting = [d for d in divisors if d * plane_bytes <= budget_bytes]
    if not fitting:
        # TODO(synk): spatial tiling with halos needed for huge planes; fall back.
        return 1
    preferred = [d for d in fitting
                 if (nplanes // d) >= min_blocks
                 and (not even_blocks or (nplanes // d) % 2 == 0)]
    return max(preferred) if preferred else max(fitting)


def blur_downsample_planes(x, h2, w2, mat_h, mat_v):
    """x: (P, H, W) f32 -> fused blur + x0.5 bilinear downsample -> (P, h2, w2)."""
    p, h, w = x.shape
    pblk = _choose_pblk(p, h * w * 4, _BLOCK_BUDGET_BYTES, min_blocks=2)
    return pl.pallas_call(
        _blur_down_kernel,
        out_shape=jax.ShapeDtypeStruct((p, h2, w2), jnp.float32),
        grid_spec=pltpu.PrefetchScalarGridSpec(
            num_scalar_prefetch=0,
            grid=(p // pblk,),
            in_specs=[
                pl.BlockSpec((pblk, h, w), lambda i: (i, 0, 0)),
                pl.BlockSpec((w, w2), lambda i: (0, 0)),
                pl.BlockSpec((h2, h), lambda i: (0, 0)),
            ],
            out_specs=pl.BlockSpec((pblk, h2, w2), lambda i: (i, 0, 0)),
        ),
        compiler_params=pltpu.CompilerParams(
            dimension_semantics=("parallel",),
            vmem_limit_bytes=_VMEM_LIMIT_BYTES,
        ),
    )(x, mat_h, mat_v)


def laplacian_level_loss(cur, nxt, nc, mat_h, mat_v):
    """Charbonnier loss of the Laplacian residual at one pyramid level.

    cur: (2*nc, h, w)  — planes [0:nc] pred, [nc:2nc] target (level i).
    nxt: (2*nc, hh, wh) — half-res planes of level i+1 (same pred/target split).
    Returns mean(sqrt(((cur_p - blur(up(nxt_p))) - (cur_t - blur(up(nxt_t))))^2 + eps)).
    """
    _, h, w = cur.shape
    _, hh, wh = nxt.shape
    pblk = _choose_pblk(nc, h * w * 4, _BLOCK_BUDGET_BYTES, even_blocks=True, min_blocks=2)
    nblk = nc // pblk
    ncores = 2 if (nblk % 2 == 0 and nblk >= 2) else 1   # v7x megacore split
    nsteps = nblk // ncores

    cur_pred = pl.BlockSpec((pblk, h, w), lambda c, i: (c * nsteps + i, 0, 0))
    cur_targ = pl.BlockSpec((pblk, h, w), lambda c, i: (c * nsteps + i + nblk, 0, 0))
    nxt_pred = pl.BlockSpec((pblk, hh, wh), lambda c, i: (c * nsteps + i, 0, 0))
    nxt_targ = pl.BlockSpec((pblk, hh, wh), lambda c, i: (c * nsteps + i + nblk, 0, 0))
    mat_h_spec = pl.BlockSpec((wh, w), lambda c, i: (0, 0))
    mat_v_spec = pl.BlockSpec((h, hh), lambda c, i: (0, 0))

    partials = pl.pallas_call(
        _lap_charb_kernel,
        out_shape=jax.ShapeDtypeStruct((ncores, 8, 128), jnp.float32),
        grid_spec=pltpu.PrefetchScalarGridSpec(
            num_scalar_prefetch=0,
            grid=(ncores, nsteps),
            in_specs=[cur_pred, cur_targ, nxt_pred, nxt_targ, mat_h_spec, mat_v_spec],
            out_specs=pl.BlockSpec((1, 8, 128), lambda c, i: (c, 0, 0)),
        ),
        compiler_params=pltpu.CompilerParams(
            dimension_semantics=("parallel", "arbitrary"),
            vmem_limit_bytes=_VMEM_LIMIT_BYTES,
        ),
    )(cur, cur, nxt, nxt, mat_h, mat_v)

    total = jnp.sum(partials[:, 0, 0])
    return total / float(nc * h * w)


@jax.jit
def laplacian_pyramid_loss(pred, target):
    n, c, h, w = pred.shape
    nc = n * c
    # Batch pred + target through every pyramid stage (plane axis = 2*nc).
    x = jnp.concatenate(
        [pred.reshape(nc, h, w), target.reshape(nc, h, w)], axis=0
    ).astype(jnp.float32)

    # Gaussian pyramid: each level is one fused blur + x0.5-downsample kernel.
    gp = [x]
    sizes = [(h, w)]
    cur = x
    ch_, cw_ = h, w
    for _ in range(NUM_LEVELS):
        h2, w2 = ch_ // 2, cw_ // 2          # floor(in * 0.5), recompute_scale_factor=True
        ah, av = _blur_down_matrices(ch_, cw_, h2, w2)
        cur = blur_downsample_planes(cur, h2, w2, ah, av)
        gp.append(cur)
        sizes.append((h2, w2))
        ch_, cw_ = h2, w2

    # Laplacian residual + Charbonnier, fused per level (reads half-res gp[i+1]).
    loss = jnp.float32(0.0)
    for i in range(NUM_LEVELS):
        lh, lw = sizes[i]
        nh, nw = sizes[i + 1]
        mat_h, mat_v = _lap_matrices(lh, lw, nh, nw)
        loss = loss + laplacian_level_loss(gp[i], gp[i + 1], nc, mat_h, mat_v)
    return loss


if __name__ == "__main__":
    key = jax.random.PRNGKey(0)
    k1, k2 = jax.random.split(key)
    pred = jax.random.normal(k1, (2, 4, 16, 16), dtype=jnp.float32)
    target = jax.random.normal(k2, (2, 4, 16, 16), dtype=jnp.float32)

    loss = laplacian_pyramid_loss(pred, target)
    jax.block_until_ready(loss)
    print("KERNEL_OK")
</pallas_src>

<mosaic_0001>
module attributes {stable_mosaic.version = 11 : i64} {
  func.func @_blur_down_kernel(%arg0: i32, %arg1: memref<8x16x16xf32, #tpu.memory_space<vmem>>, %arg2: memref<16x8xf32, #tpu.memory_space<vmem>>, %arg3: memref<8x16xf32, #tpu.memory_space<vmem>>, %arg4: memref<8x8x8xf32, #tpu.memory_space<vmem>>) attributes {dimension_semantics = [#tpu.dimension_semantics<parallel>], iteration_bounds = array<i64: 2>, scalar_prefetch = 0 : i64, scratch_operands = 0 : i64, tpu.core_type = #tpu.core_type<tc>, window_params = [{transform_indices = @transform_0, window_bounds = array<i64: 8, 16, 16>}, {pipeline_mode = #tpu.pipeline_mode<synchronous>, transform_indices = @transform_1, window_bounds = array<i64: 16, 8>}, {pipeline_mode = #tpu.pipeline_mode<synchronous>, transform_indices = @transform_2, window_bounds = array<i64: 8, 16>}, {transform_indices = @transform_3, window_bounds = array<i64: 8, 8, 8>}]} {
    %c0 = arith.constant 0 : index
    %c0_0 = arith.constant 0 : index
    %c0_1 = arith.constant 0 : index
    %0 = vector.load %arg1[%c0, %c0_0, %c0_1] : memref<8x16x16xf32, #tpu.memory_space<vmem>>, vector<8x16x16xf32>
    %c0_2 = arith.constant 0 : index
    %c0_3 = arith.constant 0 : index
    %1 = vector.load %arg2[%c0_2, %c0_3] : memref<16x8xf32, #tpu.memory_space<vmem>>, vector<16x8xf32>
    %c0_4 = arith.constant 0 : index
    %c0_5 = arith.constant 0 : index
    %2 = vector.load %arg3[%c0_4, %c0_5] : memref<8x16xf32, #tpu.memory_space<vmem>>, vector<8x16xf32>
    %3 = vector.shape_cast %1 : vector<16x8xf32> to vector<1x16x8xf32>
    %4 = vector.shape_cast %3 : vector<1x16x8xf32> to vector<1x16x8xf32>
    %5 = vector.broadcast %4 : vector<1x16x8xf32> to vector<8x16x8xf32>
    %6 = vector.shape_cast %2 : vector<8x16xf32> to vector<1x8x16xf32>
    %7 = vector.shape_cast %6 : vector<1x8x16xf32> to vector<1x8x16xf32>
    %8 = vector.broadcast %7 : vector<1x8x16xf32> to vector<8x8x16xf32>
    "tpu.trace_start"() <{level = 10 : i32, message = "phw,pwv->phv"}> : () -> ()
    %cst = arith.constant dense<0.000000e+00> : vector<8x16x8xf32>
    %9 = tpu.matmul %0, %5, %cst {dimension_numbers = #tpu.dot_dimension_numbers<[2], [1], [1], [2], [0, 0, 0, 1, 1, 2], [0], [0]>} : vector<8x16x16xf32>, vector<8x16x8xf32>, vector<8x16x8xf32> -> vector<8x16x8xf32>
    "tpu.trace_stop"() : () -> ()
    "tpu.trace_start"() <{level = 10 : i32, message = "psh,phv->psv"}> : () -> ()
    %cst_6 = arith.constant dense<0.000000e+00> : vector<8x8x8xf32>
    %10 = tpu.matmul %8, %9, %cst_6 {dimension_numbers = #tpu.dot_dimension_numbers<[2], [1], [1], [2], [0, 0, 0, 1, 1, 2], [0], [0]>} : vector<8x8x16xf32>, vector<8x16x8xf32>, vector<8x8x8xf32> -> vector<8x8x8xf32>
    "tpu.trace_stop"() : () -> ()
    %c0_7 = arith.constant 0 : index
    %c0_8 = arith.constant 0 : index
    %c0_9 = arith.constant 0 : index
    %11 = vector.load %arg4[%c0_7, %c0_8, %c0_9] : memref<8x8x8xf32, #tpu.memory_space<vmem>>, vector<8x8x8xf32>
    tpu.vector_store %arg4[%c0_7, %c0_8, %c0_9], %10 {strides = array<i32>} : memref<8x8x8xf32, #tpu.memory_space<vmem>>, vector<8x8x8xf32>,
    return
  }
  func.func @transform_0(%arg0: i32) -> (i32, i32, i32) {
    %c0_i32 = arith.constant 0 : i32
    %c0_i32_0 = arith.constant 0 : i32
    %c0_i32_1 = arith.constant 0 : i32
    return %arg0, %c0_i32, %c0_i32_0 : i32, i32, i32
  }
  func.func @transform_1(%arg0: i32) -> (i32, i32) {
    %c0_i32 = arith.constant 0 : i32
    %c0_i32_0 = arith.constant 0 : i32
    %c0_i32_1 = arith.constant 0 : i32
    return %c0_i32, %c0_i32_0 : i32, i32
  }
  func.func @transform_2(%arg0: i32) -> (i32, i32) {
    %c0_i32 = arith.constant 0 : i32
    %c0_i32_0 = arith.constant 0 : i32
    %c0_i32_1 = arith.constant 0 : i32
    return %c0_i32, %c0_i32_0 : i32, i32
  }
  func.func @transform_3(%arg0: i32) -> (i32, i32, i32) {
    %c0_i32 = arith.constant 0 : i32
    %c0_i32_0 = arith.constant 0 : i32
    %c0_i32_1 = arith.constant 0 : i32
    return %arg0, %c0_i32, %c0_i32_0 : i32, i32, i32
  }
}

module attributes {stable_mosaic.version = 11 : i64} {
  func.func @_lap_charb_kernel(%arg0: i32, %arg1: i32, %arg2: memref<4x16x16xf32, #tpu.memory_space<vmem>>, %arg3: memref<4x16x16xf32, #tpu.memory_space<vmem>>, %arg4: memref<4x8x8xf32, #tpu.memory_space<vmem>>, %arg5: memref<4x8x8xf32, #tpu.memory_space<vmem>>, %arg6: memref<8x16xf32, #tpu.memory_space<vmem>>, %arg7: memref<16x8xf32, #tpu.memory_space<vmem>>, %arg8: memref<1x8x128xf32, #tpu.memory_space<vmem>>) attributes {dimension_semantics = [#tpu.dimension_semantics<parallel>, #tpu.dimension_semantics<arbitrary>], iteration_bounds = array<i64: 2, 1>, scalar_prefetch = 0 : i64, scratch_operands = 0 : i64, tpu.core_type = #tpu.core_type<tc>, window_params = [{transform_indices = @transform_0, window_bounds = array<i64: 4, 16, 16>}, {transform_indices = @transform_1, window_bounds = array<i64: 4, 16, 16>}, {transform_indices = @transform_2, window_bounds = array<i64: 4, 8, 8>}, {transform_indices = @transform_3, window_bounds = array<i64: 4, 8, 8>}, {pipeline_mode = #tpu.pipeline_mode<synchronous>, transform_indices = @transform_4, window_bounds = array<i64: 8, 16>}, {pipeline_mode = #tpu.pipeline_mode<synchronous>, transform_indices = @transform_5, window_bounds = array<i64: 16, 8>}, {transform_indices = @transform_6, window_bounds = array<i64: 1, 8, 128>}]} {
    %c0_i32 = arith.constant 0 : i32
    %0 = arith.cmpi eq, %arg1, %c0_i32 : i32
    %1 = arith.extui %0 : i1 to i32
    %c0_i32_0 = arith.constant 0 : i32
    %2 = arith.cmpi ne, %1, %c0_i32_0 : i32
    scf.if %2 {
      %cst_25 = arith.constant 0.000000e+00 : f32
      %32 = vector.broadcast %cst_25 : f32 to vector<1x8x128xf32>
      %c0_26 = arith.constant 0 : index
      %c0_27 = arith.constant 0 : index
      %c0_28 = arith.constant 0 : index
      %33 = vector.load %arg8[%c0_26, %c0_27, %c0_28] : memref<1x8x128xf32, #tpu.memory_space<vmem>>, vector<1x8x128xf32>
      tpu.vector_store %arg8[%c0_26, %c0_27, %c0_28], %32 {strides = array<i32>} : memref<1x8x128xf32, #tpu.memory_space<vmem>>, vector<1x8x128xf32>,
    } else {
    }
    %c0 = arith.constant 0 : index
    %c0_1 = arith.constant 0 : index
    %c0_2 = arith.constant 0 : index
    %3 = vector.load %arg2[%c0, %c0_1, %c0_2] : memref<4x16x16xf32, #tpu.memory_space<vmem>>, vector<4x16x16xf32>
    %c0_3 = arith.constant 0 : index
    %c0_4 = arith.constant 0 : index
    %c0_5 = arith.constant 0 : index
    %4 = vector.load %arg3[%c0_3, %c0_4, %c0_5] : memref<4x16x16xf32, #tpu.memory_space<vmem>>, vector<4x16x16xf32>
    %5 = arith.subf %3, %4 : vector<4x16x16xf32>
    %c0_6 = arith.constant 0 : index
    %c0_7 = arith.constant 0 : index
    %c0_8 = arith.constant 0 : index
    %6 = vector.load %arg4[%c0_6, %c0_7, %c0_8] : memref<4x8x8xf32, #tpu.memory_space<vmem>>, vector<4x8x8xf32>
    %c0_9 = arith.constant 0 : index
    %c0_10 = arith.constant 0 : index
    %c0_11 = arith.constant 0 : index
    %7 = vector.load %arg5[%c0_9, %c0_10, %c0_11] : memref<4x8x8xf32, #tpu.memory_space<vmem>>, vector<4x8x8xf32>
    %8 = arith.subf %6, %7 : vector<4x8x8xf32>
    %c0_12 = arith.constant 0 : index
    %c0_13 = arith.constant 0 : index
    %9 = vector.load %arg6[%c0_12, %c0_13] : memref<8x16xf32, #tpu.memory_space<vmem>>, vector<8x16xf32>
    %c0_14 = arith.constant 0 : index
    %c0_15 = arith.constant 0 : index
    %10 = vector.load %arg7[%c0_14, %c0_15] : memref<16x8xf32, #tpu.memory_space<vmem>>, vector<16x8xf32>
    %11 = vector.shape_cast %9 : vector<8x16xf32> to vector<1x8x16xf32>
    %12 = vector.shape_cast %11 : vector<1x8x16xf32> to vector<1x8x16xf32>
    %13 = vector.broadcast %12 : vector<1x8x16xf32> to vector<4x8x16xf32>
    %14 = vector.shape_cast %10 : vector<16x8xf32> to vector<1x16x8xf32>
    %15 = vector.shape_cast %14 : vector<1x16x8xf32> to vector<1x16x8xf32>
    %16 = vector.broadcast %15 : vector<1x16x8xf32> to vector<4x16x8xf32>
    "tpu.trace_start"() <{level = 10 : i32, message = "phw,pwv->phv"}> : () -> ()
    %cst = arith.constant dense<0.000000e+00> : vector<4x8x16xf32>
    %17 = tpu.matmul %8, %13, %cst {dimension_numbers = #tpu.dot_dimension_numbers<[2], [1], [1], [2], [0, 0, 0, 1, 1, 2], [0], [0]>} : vector<4x8x8xf32>, vector<4x8x16xf32>, vector<4x8x16xf32> -> vector<4x8x16xf32>
    "tpu.trace_stop"() : () -> ()
    "tpu.trace_start"() <{level = 10 : i32, message = "psh,phv->psv"}> : () -> ()
    %cst_16 = arith.constant dense<0.000000e+00> : vector<4x16x16xf32>
    %18 = tpu.matmul %16, %17, %cst_16 {dimension_numbers = #tpu.dot_dimension_numbers<[2], [1], [1], [2], [0, 0, 0, 1, 1, 2], [0], [0]>} : vector<4x16x8xf32>, vector<4x8x16xf32>, vector<4x16x16xf32> -> vector<4x16x16xf32>
    "tpu.trace_stop"() : () -> ()
    %19 = arith.subf %5, %18 : vector<4x16x16xf32>
    %20 = arith.mulf %19, %19 : vector<4x16x16xf32>
    %cst_17 = arith.constant 9.99999997E-7 : f32
    %21 = vector.broadcast %cst_17 : f32 to vector<4x16x16xf32>
    %22 = arith.addf %20, %21 : vector<4x16x16xf32>
    %23 = math.sqrt %22 : vector<4x16x16xf32>
    %24 = vector.shape_cast %23 : vector<4x16x16xf32> to vector<1x4x16x16xf32>
    %cst_18 = arith.constant dense<0.000000e+00> : vector<1xf32>
    %25 = vector.multi_reduction <add>, %24, %cst_18 [1, 2, 3] : vector<1x4x16x16xf32> to vector<1xf32>
    %26 = vector.shape_cast %25 : vector<1xf32> to vector<1x1x1x1xf32>
    %27 = vector.extract %26[0, 0, 0, 0] : f32 from vector<1x1x1x1xf32>
    %c0_19 = arith.constant 0 : index
    %c0_20 = arith.constant 0 : index
    %c0_21 = arith.constant 0 : index
    %28 = vector.load %arg8[%c0_19, %c0_20, %c0_21] : memref<1x8x128xf32, #tpu.memory_space<vmem>>, vector<1x8x128xf32>
    %29 = vector.broadcast %27 : f32 to vector<1x8x128xf32>
    %30 = arith.addf %28, %29 : vector<1x8x128xf32>
    %c0_22 = arith.constant 0 : index
    %c0_23 = arith.constant 0 : index
    %c0_24 = arith.constant 0 : index
    %31 = vector.load %arg8[%c0_22, %c0_23, %c0_24] : memref<1x8x128xf32, #tpu.memory_space<vmem>>, vector<1x8x128xf32>
    tpu.vector_store %arg8[%c0_22, %c0_23, %c0_24], %30 {strides = array<i32>} : memref<1x8x128xf32, #tpu.memory_space<vmem>>, vector<1x8x128xf32>,
    return
  }
  func.func @transform_0(%arg0: i32, %arg1: i32) -> (i32, i32, i32) {
    %c1_i32 = arith.constant 1 : i32
    %0 = arith.muli %arg0, %c1_i32 : i32
    %1 = arith.addi %0, %arg1 : i32
    %c0_i32 = arith.constant 0 : i32
    %c0_i32_0 = arith.constant 0 : i32
    %c0_i32_1 = arith.constant 0 : i32
    return %1, %c0_i32, %c0_i32_0 : i32, i32, i32
  }
  func.func @transform_1(%arg0: i32, %arg1: i32) -> (i32, i32, i32) {
    %c1_i32 = arith.constant 1 : i32
    %0 = arith.muli %arg0, %c1_i32 : i32
    %1 = arith.addi %0, %arg1 : i32
    %c2_i32 = arith.constant 2 : i32
    %2 = arith.addi %1, %c2_i32 : i32
    %c0_i32 = arith.constant 0 : i32
    %c0_i32_0 = arith.constant 0 : i32
    %c0_i32_1 = arith.constant 0 : i32
    return %2, %c0_i32, %c0_i32_0 : i32, i32, i32
  }
  func.func @transform_2(%arg0: i32, %arg1: i32) -> (i32, i32, i32) {
    %c1_i32 = arith.constant 1 : i32
    %0 = arith.muli %arg0, %c1_i32 : i32
    %1 = arith.addi %0, %arg1 : i32
    %c0_i32 = arith.constant 0 : i32
    %c0_i32_0 = arith.constant 0 : i32
    %c0_i32_1 = arith.constant 0 : i32
    return %1, %c0_i32, %c0_i32_0 : i32, i32, i32
  }
  func.func @transform_3(%arg0: i32, %arg1: i32) -> (i32, i32, i32) {
    %c1_i32 = arith.constant 1 : i32
    %0 = arith.muli %arg0, %c1_i32 : i32
    %1 = arith.addi %0, %arg1 : i32
    %c2_i32 = arith.constant 2 : i32
    %2 = arith.addi %1, %c2_i32 : i32
    %c0_i32 = arith.constant 0 : i32
    %c0_i32_0 = arith.constant 0 : i32
    %c0_i32_1 = arith.constant 0 : i32
    return %2, %c0_i32, %c0_i32_0 : i32, i32, i32
  }
  func.func @transform_4(%arg0: i32, %arg1: i32) -> (i32, i32) {
    %c0_i32 = arith.constant 0 : i32
    %c0_i32_0 = arith.constant 0 : i32
    %c0_i32_1 = arith.constant 0 : i32
    return %c0_i32, %c0_i32_0 : i32, i32
  }
  func.func @transform_5(%arg0: i32, %arg1: i32) -> (i32, i32) {
    %c0_i32 = arith.constant 0 : i32
    %c0_i32_0 = arith.constant 0 : i32
    %c0_i32_1 = arith.constant 0 : i32
    return %c0_i32, %c0_i32_0 : i32, i32
  }
  func.func @transform_6(%arg0: i32, %arg1: i32) -> (i32, i32, i32) {
    %c0_i32 = arith.constant 0 : i32
    %c0_i32_0 = arith.constant 0 : i32
    %c0_i32_1 = arith.constant 0 : i32
    return %arg0, %c0_i32, %c0_i32_0 : i32, i32, i32
  }
}

module attributes {stable_mosaic.version = 11 : i64} {
  func.func @_blur_down_kernel(%arg0: i32, %arg1: memref<8x8x8xf32, #tpu.memory_space<vmem>>, %arg2: memref<8x4xf32, #tpu.memory_space<vmem>>, %arg3: memref<4x8xf32, #tpu.memory_space<vmem>>, %arg4: memref<8x4x4xf32, #tpu.memory_space<vmem>>) attributes {dimension_semantics = [#tpu.dimension_semantics<parallel>], iteration_bounds = array<i64: 2>, scalar_prefetch = 0 : i64, scratch_operands = 0 : i64, tpu.core_type = #tpu.core_type<tc>, window_params = [{transform_indices = @transform_0, window_bounds = array<i64: 8, 8, 8>}, {pipeline_mode = #tpu.pipeline_mode<synchronous>, transform_indices = @transform_1, window_bounds = array<i64: 8, 4>}, {pipeline_mode = #tpu.pipeline_mode<synchronous>, transform_indices = @transform_2, window_bounds = array<i64: 4, 8>}, {transform_indices = @transform_3, window_bounds = array<i64: 8, 4, 4>}]} {
    %c0 = arith.constant 0 : index
    %c0_0 = arith.constant 0 : index
    %c0_1 = arith.constant 0 : index
    %0 = vector.load %arg1[%c0, %c0_0, %c0_1] : memref<8x8x8xf32, #tpu.memory_space<vmem>>, vector<8x8x8xf32>
    %c0_2 = arith.constant 0 : index
    %c0_3 = arith.constant 0 : index
    %1 = vector.load %arg2[%c0_2, %c0_3] : memref<8x4xf32, #tpu.memory_space<vmem>>, vector<8x4xf32>
    %c0_4 = arith.constant 0 : index
    %c0_5 = arith.constant 0 : index
    %2 = vector.load %arg3[%c0_4, %c0_5] : memref<4x8xf32, #tpu.memory_space<vmem>>, vector<4x8xf32>
    %3 = vector.shape_cast %1 : vector<8x4xf32> to vector<1x8x4xf32>
    %4 = vector.shape_cast %3 : vector<1x8x4xf32> to vector<1x8x4xf32>
    %5 = vector.broadcast %4 : vector<1x8x4xf32> to vector<8x8x4xf32>
    %6 = vector.shape_cast %2 : vector<4x8xf32> to vector<1x4x8xf32>
    %7 = vector.shape_cast %6 : vector<1x4x8xf32> to vector<1x4x8xf32>
    %8 = vector.broadcast %7 : vector<1x4x8xf32> to vector<8x4x8xf32>
    "tpu.trace_start"() <{level = 10 : i32, message = "phw,pwv->phv"}> : () -> ()
    %cst = arith.constant dense<0.000000e+00> : vector<8x8x4xf32>
    %9 = tpu.matmul %0, %5, %cst {dimension_numbers = #tpu.dot_dimension_numbers<[2], [1], [1], [2], [0, 0, 0, 1, 1, 2], [0], [0]>} : vector<8x8x8xf32>, vector<8x8x4xf32>, vector<8x8x4xf32> -> vector<8x8x4xf32>
    "tpu.trace_stop"() : () -> ()
    "tpu.trace_start"() <{level = 10 : i32, message = "psh,phv->psv"}> : () -> ()
    %cst_6 = arith.constant dense<0.000000e+00> : vector<8x4x4xf32>
    %10 = tpu.matmul %8, %9, %cst_6 {dimension_numbers = #tpu.dot_dimension_numbers<[2], [1], [1], [2], [0, 0, 0, 1, 1, 2], [0], [0]>} : vector<8x4x8xf32>, vector<8x8x4xf32>, vector<8x4x4xf32> -> vector<8x4x4xf32>
    "tpu.trace_stop"() : () -> ()
    %c0_7 = arith.constant 0 : index
    %c0_8 = arith.constant 0 : index
    %c0_9 = arith.constant 0 : index
    %11 = vector.load %arg4[%c0_7, %c0_8, %c0_9] : memref<8x4x4xf32, #tpu.memory_space<vmem>>, vector<8x4x4xf32>
    tpu.vector_store %arg4[%c0_7, %c0_8, %c0_9], %10 {strides = array<i32>} : memref<8x4x4xf32, #tpu.memory_space<vmem>>, vector<8x4x4xf32>,
    return
  }
  func.func @transform_0(%arg0: i32) -> (i32, i32, i32) {
    %c0_i32 = arith.constant 0 : i32
    %c0_i32_0 = arith.constant 0 : i32
    %c0_i32_1 = arith.constant 0 : i32
    return %arg0, %c0_i32, %c0_i32_0 : i32, i32, i32
  }
  func.func @transform_1(%arg0: i32) -> (i32, i32) {
    %c0_i32 = arith.constant 0 : i32
    %c0_i32_0 = arith.constant 0 : i32
    %c0_i32_1 = arith.constant 0 : i32
    return %c0_i32, %c0_i32_0 : i32, i32
  }
  func.func @transform_2(%arg0: i32) -> (i32, i32) {
    %c0_i32 = arith.constant 0 : i32
    %c0_i32_0 = arith.constant 0 : i32
    %c0_i32_1 = arith.constant 0 : i32
    return %c0_i32, %c0_i32_0 : i32, i32
  }
  func.func @transform_3(%arg0: i32) -> (i32, i32, i32) {
    %c0_i32 = arith.constant 0 : i32
    %c0_i32_0 = arith.constant 0 : i32
    %c0_i32_1 = arith.constant 0 : i32
    return %arg0, %c0_i32, %c0_i32_0 : i32, i32, i32
  }
}

module attributes {stable_mosaic.version = 11 : i64} {
  func.func @_lap_charb_kernel(%arg0: i32, %arg1: i32, %arg2: memref<4x8x8xf32, #tpu.memory_space<vmem>>, %arg3: memref<4x8x8xf32, #tpu.memory_space<vmem>>, %arg4: memref<4x4x4xf32, #tpu.memory_space<vmem>>, %arg5: memref<4x4x4xf32, #tpu.memory_space<vmem>>, %arg6: memref<4x8xf32, #tpu.memory_space<vmem>>, %arg7: memref<8x4xf32, #tpu.memory_space<vmem>>, %arg8: memref<1x8x128xf32, #tpu.memory_space<vmem>>) attributes {dimension_semantics = [#tpu.dimension_semantics<parallel>, #tpu.dimension_semantics<arbitrary>], iteration_bounds = array<i64: 2, 1>, scalar_prefetch = 0 : i64, scratch_operands = 0 : i64, tpu.core_type = #tpu.core_type<tc>, window_params = [{transform_indices = @transform_0, window_bounds = array<i64: 4, 8, 8>}, {transform_indices = @transform_1, window_bounds = array<i64: 4, 8, 8>}, {transform_indices = @transform_2, window_bounds = array<i64: 4, 4, 4>}, {transform_indices = @transform_3, window_bounds = array<i64: 4, 4, 4>}, {pipeline_mode = #tpu.pipeline_mode<synchronous>, transform_indices = @transform_4, window_bounds = array<i64: 4, 8>}, {pipeline_mode = #tpu.pipeline_mode<synchronous>, transform_indices = @transform_5, window_bounds = array<i64: 8, 4>}, {transform_indices = @transform_6, window_bounds = array<i64: 1, 8, 128>}]} {
    %c0_i32 = arith.constant 0 : i32
    %0 = arith.cmpi eq, %arg1, %c0_i32 : i32
    %1 = arith.extui %0 : i1 to i32
    %c0_i32_0 = arith.constant 0 : i32
    %2 = arith.cmpi ne, %1, %c0_i32_0 : i32
    scf.if %2 {
      %cst_25 = arith.constant 0.000000e+00 : f32
      %32 = vector.broadcast %cst_25 : f32 to vector<1x8x128xf32>
      %c0_26 = arith.constant 0 : index
      %c0_27 = arith.constant 0 : index
      %c0_28 = arith.constant 0 : index
      %33 = vector.load %arg8[%c0_26, %c0_27, %c0_28] : memref<1x8x128xf32, #tpu.memory_space<vmem>>, vector<1x8x128xf32>
      tpu.vector_store %arg8[%c0_26, %c0_27, %c0_28], %32 {strides = array<i32>} : memref<1x8x128xf32, #tpu.memory_space<vmem>>, vector<1x8x128xf32>,
    } else {
    }
    %c0 = arith.constant 0 : index
    %c0_1 = arith.constant 0 : index
    %c0_2 = arith.constant 0 : index
    %3 = vector.load %arg2[%c0, %c0_1, %c0_2] : memref<4x8x8xf32, #tpu.memory_space<vmem>>, vector<4x8x8xf32>
    %c0_3 = arith.constant 0 : index
    %c0_4 = arith.constant 0 : index
    %c0_5 = arith.constant 0 : index
    %4 = vector.load %arg3[%c0_3, %c0_4, %c0_5] : memref<4x8x8xf32, #tpu.memory_space<vmem>>, vector<4x8x8xf32>
    %5 = arith.subf %3, %4 : vector<4x8x8xf32>
    %c0_6 = arith.constant 0 : index
    %c0_7 = arith.constant 0 : index
    %c0_8 = arith.constant 0 : index
    %6 = vector.load %arg4[%c0_6, %c0_7, %c0_8] : memref<4x4x4xf32, #tpu.memory_space<vmem>>, vector<4x4x4xf32>
    %c0_9 = arith.constant 0 : index
    %c0_10 = arith.constant 0 : index
    %c0_11 = arith.constant 0 : index
    %7 = vector.load %arg5[%c0_9, %c0_10, %c0_11] : memref<4x4x4xf32, #tpu.memory_space<vmem>>, vector<4x4x4xf32>
    %8 = arith.subf %6, %7 : vector<4x4x4xf32>
    %c0_12 = arith.constant 0 : index
    %c0_13 = arith.constant 0 : index
    %9 = vector.load %arg6[%c0_12, %c0_13] : memref<4x8xf32, #tpu.memory_space<vmem>>, vector<4x8xf32>
    %c0_14 = arith.constant 0 : index
    %c0_15 = arith.constant 0 : index
    %10 = vector.load %arg7[%c0_14, %c0_15] : memref<8x4xf32, #tpu.memory_space<vmem>>, vector<8x4xf32>
    %11 = vector.shape_cast %9 : vector<4x8xf32> to vector<1x4x8xf32>
    %12 = vector.shape_cast %11 : vector<1x4x8xf32> to vector<1x4x8xf32>
    %13 = vector.broadcast %12 : vector<1x4x8xf32> to vector<4x4x8xf32>
    %14 = vector.shape_cast %10 : vector<8x4xf32> to vector<1x8x4xf32>
    %15 = vector.shape_cast %14 : vector<1x8x4xf32> to vector<1x8x4xf32>
    %16 = vector.broadcast %15 : vector<1x8x4xf32> to vector<4x8x4xf32>
    "tpu.trace_start"() <{level = 10 : i32, message = "phw,pwv->phv"}> : () -> ()
    %cst = arith.constant dense<0.000000e+00> : vector<4x4x8xf32>
    %17 = tpu.matmul %8, %13, %cst {dimension_numbers = #tpu.dot_dimension_numbers<[2], [1], [1], [2], [0, 0, 0, 1, 1, 2], [0], [0]>} : vector<4x4x4xf32>, vector<4x4x8xf32>, vector<4x4x8xf32> -> vector<4x4x8xf32>
    "tpu.trace_stop"() : () -> ()
    "tpu.trace_start"() <{level = 10 : i32, message = "psh,phv->psv"}> : () -> ()
    %cst_16 = arith.constant dense<0.000000e+00> : vector<4x8x8xf32>
    %18 = tpu.matmul %16, %17, %cst_16 {dimension_numbers = #tpu.dot_dimension_numbers<[2], [1], [1], [2], [0, 0, 0, 1, 1, 2], [0], [0]>} : vector<4x8x4xf32>, vector<4x4x8xf32>, vector<4x8x8xf32> -> vector<4x8x8xf32>
    "tpu.trace_stop"() : () -> ()
    %19 = arith.subf %5, %18 : vector<4x8x8xf32>
    %20 = arith.mulf %19, %19 : vector<4x8x8xf32>
    %cst_17 = arith.constant 9.99999997E-7 : f32
    %21 = vector.broadcast %cst_17 : f32 to vector<4x8x8xf32>
    %22 = arith.addf %20, %21 : vector<4x8x8xf32>
    %23 = math.sqrt %22 : vector<4x8x8xf32>
    %24 = vector.shape_cast %23 : vector<4x8x8xf32> to vector<1x4x8x8xf32>
    %cst_18 = arith.constant dense<0.000000e+00> : vector<1xf32>
    %25 = vector.multi_reduction <add>, %24, %cst_18 [1, 2, 3] : vector<1x4x8x8xf32> to vector<1xf32>
    %26 = vector.shape_cast %25 : vector<1xf32> to vector<1x1x1x1xf32>
    %27 = vector.extract %26[0, 0, 0, 0] : f32 from vector<1x1x1x1xf32>
    %c0_19 = arith.constant 0 : index
    %c0_20 = arith.constant 0 : index
    %c0_21 = arith.constant 0 : index
    %28 = vector.load %arg8[%c0_19, %c0_20, %c0_21] : memref<1x8x128xf32, #tpu.memory_space<vmem>>, vector<1x8x128xf32>
    %29 = vector.broadcast %27 : f32 to vector<1x8x128xf32>
    %30 = arith.addf %28, %29 : vector<1x8x128xf32>
    %c0_22 = arith.constant 0 : index
    %c0_23 = arith.constant 0 : index
    %c0_24 = arith.constant 0 : index
    %31 = vector.load %arg8[%c0_22, %c0_23, %c0_24] : memref<1x8x128xf32, #tpu.memory_space<vmem>>, vector<1x8x128xf32>
    tpu.vector_store %arg8[%c0_22, %c0_23, %c0_24], %30 {strides = array<i32>} : memref<1x8x128xf32, #tpu.memory_space<vmem>>, vector<1x8x128xf32>,
    return
  }
  func.func @transform_0(%arg0: i32, %arg1: i32) -> (i32, i32, i32) {
    %c1_i32 = arith.constant 1 : i32
    %0 = arith.muli %arg0, %c1_i32 : i32
    %1 = arith.addi %0, %arg1 : i32
    %c0_i32 = arith.constant 0 : i32
    %c0_i32_0 = arith.constant 0 : i32
    %c0_i32_1 = arith.constant 0 : i32
    return %1, %c0_i32, %c0_i32_0 : i32, i32, i32
  }
  func.func @transform_1(%arg0: i32, %arg1: i32) -> (i32, i32, i32) {
    %c1_i32 = arith.constant 1 : i32
    %0 = arith.muli %arg0, %c1_i32 : i32
    %1 = arith.addi %0, %arg1 : i32
    %c2_i32 = arith.constant 2 : i32
    %2 = arith.addi %1, %c2_i32 : i32
    %c0_i32 = arith.constant 0 : i32
    %c0_i32_0 = arith.constant 0 : i32
    %c0_i32_1 = arith.constant 0 : i32
    return %2, %c0_i32, %c0_i32_0 : i32, i32, i32
  }
  func.func @transform_2(%arg0: i32, %arg1: i32) -> (i32, i32, i32) {
    %c1_i32 = arith.constant 1 : i32
    %0 = arith.muli %arg0, %c1_i32 : i32
    %1 = arith.addi %0, %arg1 : i32
    %c0_i32 = arith.constant 0 : i32
    %c0_i32_0 = arith.constant 0 : i32
    %c0_i32_1 = arith.constant 0 : i32
    return %1, %c0_i32, %c0_i32_0 : i32, i32, i32
  }
  func.func @transform_3(%arg0: i32, %arg1: i32) -> (i32, i32, i32) {
    %c1_i32 = arith.constant 1 : i32
    %0 = arith.muli %arg0, %c1_i32 : i32
    %1 = arith.addi %0, %arg1 : i32
    %c2_i32 = arith.constant 2 : i32
    %2 = arith.addi %1, %c2_i32 : i32
    %c0_i32 = arith.constant 0 : i32
    %c0_i32_0 = arith.constant 0 : i32
    %c0_i32_1 = arith.constant 0 : i32
    return %2, %c0_i32, %c0_i32_0 : i32, i32, i32
  }
  func.func @transform_4(%arg0: i32, %arg1: i32) -> (i32, i32) {
    %c0_i32 = arith.constant 0 : i32
    %c0_i32_0 = arith.constant 0 : i32
    %c0_i32_1 = arith.constant 0 : i32
    return %c0_i32, %c0_i32_0 : i32, i32
  }
  func.func @transform_5(%arg0: i32, %arg1: i32) -> (i32, i32) {
    %c0_i32 = arith.constant 0 : i32
    %c0_i32_0 = arith.constant 0 : i32
    %c0_i32_1 = arith.constant 0 : i32
    return %c0_i32, %c0_i32_0 : i32, i32
  }
  func.func @transform_6(%arg0: i32, %arg1: i32) -> (i32, i32, i32) {
    %c0_i32 = arith.constant 0 : i32
    %c0_i32_0 = arith.constant 0 : i32
    %c0_i32_1 = arith.constant 0 : i32
    return %arg0, %c0_i32, %c0_i32_0 : i32, i32, i32
  }
}

module attributes {stable_mosaic.version = 11 : i64} {
  func.func @_blur_down_kernel(%arg0: i32, %arg1: memref<8x4x4xf32, #tpu.memory_space<vmem>>, %arg2: memref<4x2xf32, #tpu.memory_space<vmem>>, %arg3: memref<2x4xf32, #tpu.memory_space<vmem>>, %arg4: memref<8x2x2xf32, #tpu.memory_space<vmem>>) attributes {dimension_semantics = [#tpu.dimension_semantics<parallel>], iteration_bounds = array<i64: 2>, scalar_prefetch = 0 : i64, scratch_operands = 0 : i64, tpu.core_type = #tpu.core_type<tc>, window_params = [{transform_indices = @transform_0, window_bounds = array<i64: 8, 4, 4>}, {pipeline_mode = #tpu.pipeline_mode<synchronous>, transform_indices = @transform_1, window_bounds = array<i64: 4, 2>}, {pipeline_mode = #tpu.pipeline_mode<synchronous>, transform_indices = @transform_2, window_bounds = array<i64: 2, 4>}, {transform_indices = @transform_3, window_bounds = array<i64: 8, 2, 2>}]} {
    %c0 = arith.constant 0 : index
    %c0_0 = arith.constant 0 : index
    %c0_1 = arith.constant 0 : index
    %0 = vector.load %arg1[%c0, %c0_0, %c0_1] : memref<8x4x4xf32, #tpu.memory_space<vmem>>, vector<8x4x4xf32>
    %c0_2 = arith.constant 0 : index
    %c0_3 = arith.constant 0 : index
    %1 = vector.load %arg2[%c0_2, %c0_3] : memref<4x2xf32, #tpu.memory_space<vmem>>, vector<4x2xf32>
    %c0_4 = arith.constant 0 : index
    %c0_5 = arith.constant 0 : index
    %2 = vector.load %arg3[%c0_4, %c0_5] : memref<2x4xf32, #tpu.memory_space<vmem>>, vector<2x4xf32>
    %3 = vector.shape_cast %1 : vector<4x2xf32> to vector<1x4x2xf32>
    %4 = vector.shape_cast %3 : vector<1x4x2xf32> to vector<1x4x2xf32>
    %5 = vector.broadcast %4 : vector<1x4x2xf32> to vector<8x4x2xf32>
    %6 = vector.shape_cast %2 : vector<2x4xf32> to vector<1x2x4xf32>
    %7 = vector.shape_cast %6 : vector<1x2x4xf32> to vector<1x2x4xf32>
    %8 = vector.broadcast %7 : vector<1x2x4xf32> to vector<8x2x4xf32>
    "tpu.trace_start"() <{level = 10 : i32, message = "phw,pwv->phv"}> : () -> ()
    %cst = arith.constant dense<0.000000e+00> : vector<8x4x2xf32>
    %9 = tpu.matmul %0, %5, %cst {dimension_numbers = #tpu.dot_dimension_numbers<[2], [1], [1], [2], [0, 0, 0, 1, 1, 2], [0], [0]>} : vector<8x4x4xf32>, vector<8x4x2xf32>, vector<8x4x2xf32> -> vector<8x4x2xf32>
    "tpu.trace_stop"() : () -> ()
    "tpu.trace_start"() <{level = 10 : i32, message = "psh,phv->psv"}> : () -> ()
    %cst_6 = arith.constant dense<0.000000e+00> : vector<8x2x2xf32>
    %10 = tpu.matmul %8, %9, %cst_6 {dimension_numbers = #tpu.dot_dimension_numbers<[2], [1], [1], [2], [0, 0, 0, 1, 1, 2], [0], [0]>} : vector<8x2x4xf32>, vector<8x4x2xf32>, vector<8x2x2xf32> -> vector<8x2x2xf32>
    "tpu.trace_stop"() : () -> ()
    %c0_7 = arith.constant 0 : index
    %c0_8 = arith.constant 0 : index
    %c0_9 = arith.constant 0 : index
    %11 = vector.load %arg4[%c0_7, %c0_8, %c0_9] : memref<8x2x2xf32, #tpu.memory_space<vmem>>, vector<8x2x2xf32>
    tpu.vector_store %arg4[%c0_7, %c0_8, %c0_9], %10 {strides = array<i32>} : memref<8x2x2xf32, #tpu.memory_space<vmem>>, vector<8x2x2xf32>,
    return
  }
  func.func @transform_0(%arg0: i32) -> (i32, i32, i32) {
    %c0_i32 = arith.constant 0 : i32
    %c0_i32_0 = arith.constant 0 : i32
    %c0_i32_1 = arith.constant 0 : i32
    return %arg0, %c0_i32, %c0_i32_0 : i32, i32, i32
  }
  func.func @transform_1(%arg0: i32) -> (i32, i32) {
    %c0_i32 = arith.constant 0 : i32
    %c0_i32_0 = arith.constant 0 : i32
    %c0_i32_1 = arith.constant 0 : i32
    return %c0_i32, %c0_i32_0 : i32, i32
  }
  func.func @transform_2(%arg0: i32) -> (i32, i32) {
    %c0_i32 = arith.constant 0 : i32
    %c0_i32_0 = arith.constant 0 : i32
    %c0_i32_1 = arith.constant 0 : i32
    return %c0_i32, %c0_i32_0 : i32, i32
  }
  func.func @transform_3(%arg0: i32) -> (i32, i32, i32) {
    %c0_i32 = arith.constant 0 : i32
    %c0_i32_0 = arith.constant 0 : i32
    %c0_i32_1 = arith.constant 0 : i32
    return %arg0, %c0_i32, %c0_i32_0 : i32, i32, i32
  }
}

module attributes {stable_mosaic.version = 11 : i64} {
  func.func @_lap_charb_kernel(%arg0: i32, %arg1: i32, %arg2: memref<4x4x4xf32, #tpu.memory_space<vmem>>, %arg3: memref<4x4x4xf32, #tpu.memory_space<vmem>>, %arg4: memref<4x2x2xf32, #tpu.memory_space<vmem>>, %arg5: memref<4x2x2xf32, #tpu.memory_space<vmem>>, %arg6: memref<2x4xf32, #tpu.memory_space<vmem>>, %arg7: memref<4x2xf32, #tpu.memory_space<vmem>>, %arg8: memref<1x8x128xf32, #tpu.memory_space<vmem>>) attributes {dimension_semantics = [#tpu.dimension_semantics<parallel>, #tpu.dimension_semantics<arbitrary>], iteration_bounds = array<i64: 2, 1>, scalar_prefetch = 0 : i64, scratch_operands = 0 : i64, tpu.core_type = #tpu.core_type<tc>, window_params = [{transform_indices = @transform_0, window_bounds = array<i64: 4, 4, 4>}, {transform_indices = @transform_1, window_bounds = array<i64: 4, 4, 4>}, {transform_indices = @transform_2, window_bounds = array<i64: 4, 2, 2>}, {transform_indices = @transform_3, window_bounds = array<i64: 4, 2, 2>}, {pipeline_mode = #tpu.pipeline_mode<synchronous>, transform_indices = @transform_4, window_bounds = array<i64: 2, 4>}, {pipeline_mode = #tpu.pipeline_mode<synchronous>, transform_indices = @transform_5, window_bounds = array<i64: 4, 2>}, {transform_indices = @transform_6, window_bounds = array<i64: 1, 8, 128>}]} {
    %c0_i32 = arith.constant 0 : i32
    %0 = arith.cmpi eq, %arg1, %c0_i32 : i32
    %1 = arith.extui %0 : i1 to i32
    %c0_i32_0 = arith.constant 0 : i32
    %2 = arith.cmpi ne, %1, %c0_i32_0 : i32
    scf.if %2 {
      %cst_25 = arith.constant 0.000000e+00 : f32
      %32 = vector.broadcast %cst_25 : f32 to vector<1x8x128xf32>
      %c0_26 = arith.constant 0 : index
      %c0_27 = arith.constant 0 : index
      %c0_28 = arith.constant 0 : index
      %33 = vector.load %arg8[%c0_26, %c0_27, %c0_28] : memref<1x8x128xf32, #tpu.memory_space<vmem>>, vector<1x8x128xf32>
      tpu.vector_store %arg8[%c0_26, %c0_27, %c0_28], %32 {strides = array<i32>} : memref<1x8x128xf32, #tpu.memory_space<vmem>>, vector<1x8x128xf32>,
    } else {
    }
    %c0 = arith.constant 0 : index
    %c0_1 = arith.constant 0 : index
    %c0_2 = arith.constant 0 : index
    %3 = vector.load %arg2[%c0, %c0_1, %c0_2] : memref<4x4x4xf32, #tpu.memory_space<vmem>>, vector<4x4x4xf32>
    %c0_3 = arith.constant 0 : index
    %c0_4 = arith.constant 0 : index
    %c0_5 = arith.constant 0 : index
    %4 = vector.load %arg3[%c0_3, %c0_4, %c0_5] : memref<4x4x4xf32, #tpu.memory_space<vmem>>, vector<4x4x4xf32>
    %5 = arith.subf %3, %4 : vector<4x4x4xf32>
    %c0_6 = arith.constant 0 : index
    %c0_7 = arith.constant 0 : index
    %c0_8 = arith.constant 0 : index
    %6 = vector.load %arg4[%c0_6, %c0_7, %c0_8] : memref<4x2x2xf32, #tpu.memory_space<vmem>>, vector<4x2x2xf32>
    %c0_9 = arith.constant 0 : index
    %c0_10 = arith.constant 0 : index
    %c0_11 = arith.constant 0 : index
    %7 = vector.load %arg5[%c0_9, %c0_10, %c0_11] : memref<4x2x2xf32, #tpu.memory_space<vmem>>, vector<4x2x2xf32>
    %8 = arith.subf %6, %7 : vector<4x2x2xf32>
    %c0_12 = arith.constant 0 : index
    %c0_13 = arith.constant 0 : index
    %9 = vector.load %arg6[%c0_12, %c0_13] : memref<2x4xf32, #tpu.memory_space<vmem>>, vector<2x4xf32>
    %c0_14 = arith.constant 0 : index
    %c0_15 = arith.constant 0 : index
    %10 = vector.load %arg7[%c0_14, %c0_15] : memref<4x2xf32, #tpu.memory_space<vmem>>, vector<4x2xf32>
    %11 = vector.shape_cast %9 : vector<2x4xf32> to vector<1x2x4xf32>
    %12 = vector.shape_cast %11 : vector<1x2x4xf32> to vector<1x2x4xf32>
    %13 = vector.broadcast %12 : vector<1x2x4xf32> to vector<4x2x4xf32>
    %14 = vector.shape_cast %10 : vector<4x2xf32> to vector<1x4x2xf32>
    %15 = vector.shape_cast %14 : vector<1x4x2xf32> to vector<1x4x2xf32>
    %16 = vector.broadcast %15 : vector<1x4x2xf32> to vector<4x4x2xf32>
    "tpu.trace_start"() <{level = 10 : i32, message = "phw,pwv->phv"}> : () -> ()
    %cst = arith.constant dense<0.000000e+00> : vector<4x2x4xf32>
    %17 = tpu.matmul %8, %13, %cst {dimension_numbers = #tpu.dot_dimension_numbers<[2], [1], [1], [2], [0, 0, 0, 1, 1, 2], [0], [0]>} : vector<4x2x2xf32>, vector<4x2x4xf32>, vector<4x2x4xf32> -> vector<4x2x4xf32>
    "tpu.trace_stop"() : () -> ()
    "tpu.trace_start"() <{level = 10 : i32, message = "psh,phv->psv"}> : () -> ()
    %cst_16 = arith.constant dense<0.000000e+00> : vector<4x4x4xf32>
    %18 = tpu.matmul %16, %17, %cst_16 {dimension_numbers = #tpu.dot_dimension_numbers<[2], [1], [1], [2], [0, 0, 0, 1, 1, 2], [0], [0]>} : vector<4x4x2xf32>, vector<4x2x4xf32>, vector<4x4x4xf32> -> vector<4x4x4xf32>
    "tpu.trace_stop"() : () -> ()
    %19 = arith.subf %5, %18 : vector<4x4x4xf32>
    %20 = arith.mulf %19, %19 : vector<4x4x4xf32>
    %cst_17 = arith.constant 9.99999997E-7 : f32
    %21 = vector.broadcast %cst_17 : f32 to vector<4x4x4xf32>
    %22 = arith.addf %20, %21 : vector<4x4x4xf32>
    %23 = math.sqrt %22 : vector<4x4x4xf32>
    %24 = vector.shape_cast %23 : vector<4x4x4xf32> to vector<1x4x4x4xf32>
    %cst_18 = arith.constant dense<0.000000e+00> : vector<1xf32>
    %25 = vector.multi_reduction <add>, %24, %cst_18 [1, 2, 3] : vector<1x4x4x4xf32> to vector<1xf32>
    %26 = vector.shape_cast %25 : vector<1xf32> to vector<1x1x1x1xf32>
    %27 = vector.extract %26[0, 0, 0, 0] : f32 from vector<1x1x1x1xf32>
    %c0_19 = arith.constant 0 : index
    %c0_20 = arith.constant 0 : index
    %c0_21 = arith.constant 0 : index
    %28 = vector.load %arg8[%c0_19, %c0_20, %c0_21] : memref<1x8x128xf32, #tpu.memory_space<vmem>>, vector<1x8x128xf32>
    %29 = vector.broadcast %27 : f32 to vector<1x8x128xf32>
    %30 = arith.addf %28, %29 : vector<1x8x128xf32>
    %c0_22 = arith.constant 0 : index
    %c0_23 = arith.constant 0 : index
    %c0_24 = arith.constant 0 : index
    %31 = vector.load %arg8[%c0_22, %c0_23, %c0_24] : memref<1x8x128xf32, #tpu.memory_space<vmem>>, vector<1x8x128xf32>
    tpu.vector_store %arg8[%c0_22, %c0_23, %c0_24], %30 {strides = array<i32>} : memref<1x8x128xf32, #tpu.memory_space<vmem>>, vector<1x8x128xf32>,
    return
  }
  func.func @transform_0(%arg0: i32, %arg1: i32) -> (i32, i32, i32) {
    %c1_i32 = arith.constant 1 : i32
    %0 = arith.muli %arg0, %c1_i32 : i32
    %1 = arith.addi %0, %arg1 : i32
    %c0_i32 = arith.constant 0 : i32
    %c0_i32_0 = arith.constant 0 : i32
    %c0_i32_1 = arith.constant 0 : i32
    return %1, %c0_i32, %c0_i32_0 : i32, i32, i32
  }
  func.func @transform_1(%arg0: i32, %arg1: i32) -> (i32, i32, i32) {
    %c1_i32 = arith.constant 1 : i32
    %0 = arith.muli %arg0, %c1_i32 : i32
    %1 = arith.addi %0, %arg1 : i32
    %c2_i32 = arith.constant 2 : i32
    %2 = arith.addi %1, %c2_i32 : i32
    %c0_i32 = arith.constant 0 : i32
    %c0_i32_0 = arith.constant 0 : i32
    %c0_i32_1 = arith.constant 0 : i32
    return %2, %c0_i32, %c0_i32_0 : i32, i32, i32
  }
  func.func @transform_2(%arg0: i32, %arg1: i32) -> (i32, i32, i32) {
    %c1_i32 = arith.constant 1 : i32
    %0 = arith.muli %arg0, %c1_i32 : i32
    %1 = arith.addi %0, %arg1 : i32
    %c0_i32 = arith.constant 0 : i32
    %c0_i32_0 = arith.constant 0 : i32
    %c0_i32_1 = arith.constant 0 : i32
    return %1, %c0_i32, %c0_i32_0 : i32, i32, i32
  }
  func.func @transform_3(%arg0: i32, %arg1: i32) -> (i32, i32, i32) {
    %c1_i32 = arith.constant 1 : i32
    %0 = arith.muli %arg0, %c1_i32 : i32
    %1 = arith.addi %0, %arg1 : i32
    %c2_i32 = arith.constant 2 : i32
    %2 = arith.addi %1, %c2_i32 : i32
    %c0_i32 = arith.constant 0 : i32
    %c0_i32_0 = arith.constant 0 : i32
    %c0_i32_1 = arith.constant 0 : i32
    return %2, %c0_i32, %c0_i32_0 : i32, i32, i32
  }
  func.func @transform_4(%arg0: i32, %arg1: i32) -> (i32, i32) {
    %c0_i32 = arith.constant 0 : i32
    %c0_i32_0 = arith.constant 0 : i32
    %c0_i32_1 = arith.constant 0 : i32
    return %c0_i32, %c0_i32_0 : i32, i32
  }
  func.func @transform_5(%arg0: i32, %arg1: i32) -> (i32, i32) {
    %c0_i32 = arith.constant 0 : i32
    %c0_i32_0 = arith.constant 0 : i32
    %c0_i32_1 = arith.constant 0 : i32
    return %c0_i32, %c0_i32_0 : i32, i32
  }
  func.func @transform_6(%arg0: i32, %arg1: i32) -> (i32, i32, i32) {
    %c0_i32 = arith.constant 0 : i32
    %c0_i32_0 = arith.constant 0 : i32
    %c0_i32_1 = arith.constant 0 : i32
    return %arg0, %c0_i32, %c0_i32_0 : i32, i32, i32
  }
}

</mosaic_0001>

<bundles_post_ra>
// kernel: laplacian_pyramid_loss.6
= control target key start
LH: loop header
LB: loop body
LE: loop exit
PB: predicated region body
PF: predicated region fallthrough
CT: control target
= control target key end

     0   :  { %s730_s12 = smov 0   ;;  %s810_s0 = inlined_call_operand.vmem [shape: f32[16,16,16], index: 0, kind: input, shape index: {}]   ;;  %s811_s1 = inlined_call_operand.vmem [shape: f32[16,8], index: 1, kind: input, shape index: {}]   ;;  %s812_s2 = inlined_call_operand.vmem [shape: f32[8,16], index: 2, kind: input, shape index: {}]   ;;  %s813_s3 = inlined_call_operand.vmem [shape: f32[16,8,8], index: 3, kind: output, shape index: {}]  }
   0x1 LB: > { %s657_s13 = sadd.s32 4294967295, %s708_s12   ;;  %p661_p0 = scmp.ge.s32.totalorder %s708_s12, 1  ;;  %s708_s12 = sphi %s730_s12, %s13_s12  }
   0x2   : > { %p139_p1 = scmp.lt.s32.totalorder %s708_s12, 3 }
   0x4   : > { %p140_p2 = pnand %p661_p0, %p139_p1 }
   0x5   : > { %s662_s18 = sshll.u32 (!%p140_p2), %s657_s13, 3 }
   0x6   : > { %143 = sbr.rel (%p140_p2) target bundleno = 312 (0x138), region = 32  ;;  %p165_p3 = scmp.lt.s32.totalorder (!%p140_p2), %s662_s18, 15 }
   0xb   : > { %v194_v0 = vld [vmem:[%s811_s1 + $0x8] sm:$0xff]  ;;  %v193_v1 = vld [vmem:[%s811_s1] sm:$0xff]  ;;  %s815_s18 = smov (!%p165_p3, %s662_s18), 15  ;;  %vm196_vm0 = vcmask 130048   ;;  %vm592_vm1 = vcmask 64512  }
   0xc   : > { %275 = vmatpush.msra.mxu2 %v194_v0  ;;  %304 = vmatpush.msra.mxu3 %v194_v0  ;;  %s693_s19 = sshll.u32 %s815_s18, 4  ;;  %v195_v24 = vld [vmem:[%s812_s2] sm:$0xff]  ;;  %s666_s25 = sshll.u32 %s815_s18, 3 }
   0xd   : > { %217 = vmatpush.msra.mxu0 %v194_v0  ;;  %246 = vmatpush.msra.mxu1 %v194_v0  ;;  %s750_s22 = scalar_lea.vmem %s810_s0, %s693_s19  ;;  %s175_s28 = scalar_lea.vmem %s813_s3, %s666_s25 }
   0xe   : > { %276 = vmatpush.msra.mxu2 %v193_v1  ;;  %305 = vmatpush.msra.mxu3 %v193_v1  ;;  %v181_v2 = vld [vmem:[%s750_s22 + $0x20] sm:$0xff]  ;;  %v183_v3 = vld [vmem:[%s750_s22 + $0x30] sm:$0xff]  ;;  %v182_v6 = vld [vmem:[%s750_s22 + $0x28] sm:$0xff] }
   0xf   : > { %218 = vmatpush.msra.mxu0 %v193_v1  ;;  %247 = vmatpush.msra.mxu1 %v193_v1  ;;  %v177_v4 = vld [vmem:[%s750_s22] sm:$0xff]  ;;  %v179_v5 = vld [vmem:[%s750_s22 + $0x10] sm:$0xff]  ;;  %v184_v7 = vld [vmem:[%s750_s22 + $0x38] sm:$0xff] }
  0x10   : > { %391 = vmatpush.msrb.mxu2 %v194_v0  ;;  %420 = vmatpush.msrb.mxu3 %v194_v0  ;;  %v178_v8 = vld [vmem:[%s750_s22 + $0x8] sm:$0xff]  ;;  %v180_v9 = vld [vmem:[%s750_s22 + $0x18] sm:$0xff]  ;;  %v189_v10 = vld [vmem:[%s750_s22 + $0x60] sm:$0xff] }
  0x11   : > { %333 = vmatpush.msrb.mxu0 %v194_v0  ;;  %362 = vmatpush.msrb.mxu1 %v194_v0  ;;  %v191_v11 = vld [vmem:[%s750_s22 + $0x70] sm:$0xff]  ;;  %v185_v12 = vld [vmem:[%s750_s22 + $0x40] sm:$0xff]  ;;  %v190_v14 = vld [vmem:[%s750_s22 + $0x68] sm:$0xff] }
  0x12   : > { %392 = vmatpush.msrb.mxu2 %v193_v1  ;;  %421 = vmatpush.msrb.mxu3 %v193_v1  ;;  %v187_v13 = vld [vmem:[%s750_s22 + $0x50] sm:$0xff]  ;;  %v192_v15 = vld [vmem:[%s750_s22 + $0x78] sm:$0xff]  ;;  %v186_v16 = vld [vmem:[%s750_s22 + $0x48] sm:$0xff] }
  0x13   : > { %671 = vmatmul.msk.f32.vlgmr.msra.gmra.mxu2 %vm196_vm0, %v181_v2  ;;  %673 = vmatmul.msk.f32.vlgmr.msra.gmra.mxu3 %vm196_vm0, %v183_v3  ;;  %v188_v17 = vld [vmem:[%s750_s22 + $0x58] sm:$0xff] }
  0x14   : > { %667 = vmatmul.msk.f32.vlgmr.msra.gmra.mxu0 %vm196_vm0, %v177_v4  ;;  %669 = vmatmul.msk.f32.vlgmr.msra.gmra.mxu1 %vm196_vm0, %v179_v5 }
  0x15   : > { %334 = vmatpush.msrb.mxu0 %v193_v1  ;;  %363 = vmatpush.msrb.mxu1 %v193_v1 }
  0x1b   : > { %672 = vmatmul.msk.f32.gmra.mxu2 %vm196_vm0, %v182_v6  ;;  %674 = vmatmul.msk.f32.gmra.mxu3 %vm196_vm0, %v184_v7 }
  0x1c   : > { %668 = vmatmul.msk.f32.gmra.mxu0 %vm196_vm0, %v178_v8  ;;  %670 = vmatmul.msk.f32.gmra.mxu1 %vm196_vm0, %v180_v9 }
  0x23   : > { %679 = vmatmul.msk.f32.vlgmr.msrb.gmra.mxu2 %vm196_vm0, %v189_v10  ;;  %681 = vmatmul.msk.f32.vlgmr.msrb.gmra.mxu3 %vm196_vm0, %v191_v11 }
  0x24   : > { %675 = vmatmul.msk.f32.vlgmr.msrb.gmra.mxu0 %vm196_vm0, %v185_v12  ;;  %677 = vmatmul.msk.f32.vlgmr.msrb.gmra.mxu1 %vm196_vm0, %v187_v13 }
  0x2b   : > { %680 = vmatmul.msk.f32.gmra.mxu2 %vm196_vm0, %v190_v14  ;;  %682 = vmatmul.msk.f32.gmra.mxu3 %vm196_vm0, %v192_v15 }
  0x2c   : > { %676 = vmatmul.msk.f32.gmra.mxu0 %vm196_vm0, %v186_v16  ;;  %678 = vmatmul.msk.f32.gmra.mxu1 %vm196_vm0, %v188_v17 }
  0x91   : > { %v220_v18 = vpop.f32.mrf.mxu0  ;;  %v249_v19 = vpop.f32.mrf.mxu1 }
  0x96   : > { %v278_v20 = vpop.f32.mrf.mxu2  ;;  %v307_v21 = vpop.f32.mrf.mxu3 }
  0x99   : > { %v223_v22 = vpop.f32.mrf.mxu0  ;;  %v252_v23 = vpop.f32.mrf.mxu1 }
  0x9a   : > { %446 = vmatpush.msra.mxu0 %v223_v22  ;;  %466 = vmatpush.msra.mxu1 %v252_v23 }
  0x9c   : > { %447 = vmatpush.msra.mxu0 %v220_v18  ;;  %467 = vmatpush.msra.mxu1 %v249_v19 }
  0x9d   : > { %683 = vmatmul.msk.f32.vlgmr.msra.gmra.mxu0 %vm196_vm0, %v195_v24  ;;  %684 = vmatmul.msk.f32.vlgmr.msra.gmra.mxu1 %vm196_vm0, %v195_v24 }
  0x9e   : > { %v281_v25 = vpop.f32.mrf.mxu2  ;;  %v310_v26 = vpop.f32.mrf.mxu3 }
  0x9f   : > { %486 = vmatpush.msra.mxu2 %v281_v25  ;;  %506 = vmatpush.msra.mxu3 %v310_v26 }
  0xa1   : > { %487 = vmatpush.msra.mxu2 %v278_v20  ;;  %507 = vmatpush.msra.mxu3 %v307_v21  ;;  %v336_v27 = vpop.f32.mrf.mxu0  ;;  %v365_v28 = vpop.f32.mrf.mxu1 }
  0xa2   : > { %685 = vmatmul.msk.f32.vlgmr.msra.gmra.mxu2 %vm196_vm0, %v195_v24  ;;  %686 = vmatmul.msk.f32.vlgmr.msra.gmra.mxu3 %vm196_vm0, %v195_v24 }
  0xa6   : > { %v394_v29 = vpop.f32.mrf.mxu2  ;;  %v423_v30 = vpop.f32.mrf.mxu3 }
  0xa9   : > { %v339_v31 = vpop.f32.mrf.mxu0  ;;  %v368_v32 = vpop.f32.mrf.mxu1 }
  0xaa   : > { %526 = vmatpush.msrb.mxu0 %v339_v31  ;;  %546 = vmatpush.msrb.mxu1 %v368_v32 }
  0xac   : > { %527 = vmatpush.msrb.mxu0 %v336_v27  ;;  %547 = vmatpush.msrb.mxu1 %v365_v28 }
  0xad   : > { %687 = vmatmul.msk.f32.vlgmr.msrb.gmra.mxu0 %vm196_vm0, %v195_v24  ;;  %688 = vmatmul.msk.f32.vlgmr.msrb.gmra.mxu1 %vm196_vm0, %v195_v24 }
  0xae   : > { %v397_v33 = vpop.f32.mrf.mxu2  ;;  %v426_v34 = vpop.f32.mrf.mxu3 }
  0xaf   : > { %566 = vmatpush.msrb.mxu2 %v397_v33  ;;  %586 = vmatpush.msrb.mxu3 %v426_v34 }
  0xb1   : > { %567 = vmatpush.msrb.mxu2 %v394_v29  ;;  %587 = vmatpush.msrb.mxu3 %v423_v30 }
  0xb2   : > { %689 = vmatmul.msk.f32.vlgmr.msrb.gmra.mxu2 %vm196_vm0, %v195_v24  ;;  %690 = vmatmul.msk.f32.vlgmr.msrb.gmra.mxu3 %vm196_vm0, %v195_v24 }
 0x11a   : > { %v449_v35 = vpop.f32.mrf.mxu0  ;;  %v469_v36 = vpop.f32.mrf.mxu1 }
 0x11b   : > { %593 = vst.msk [vmem:[%s175_s28] sm:$0xff] %vm592_vm1, %v449_v35 }
 0x11c   : > { %594 = vst.msk [vmem:[%s175_s28 + $0x8] sm:$0xff] %vm592_vm1, %v469_v36 }
 0x125   : > { %v489_v37 = vpop.f32.mrf.mxu2  ;;  %v509_v38 = vpop.f32.mrf.mxu3 }
 0x126   : > { %595 = vst.msk [vmem:[%s175_s28 + $0x10] sm:$0xff] %vm592_vm1, %v489_v37 }
 0x127   : > { %596 = vst.msk [vmem:[%s175_s28 + $0x18] sm:$0xff] %vm592_vm1, %v509_v38 }
 0x12a   : > { %v529_v39 = vpop.f32.mrf.mxu0  ;;  %v549_v40 = vpop.f32.mrf.mxu1 }
 0x12b   : > { %597 = vst.msk [vmem:[%s175_s28 + $0x20] sm:$0xff] %vm592_vm1, %v529_v39 }
 0x12c   : > { %598 = vst.msk [vmem:[%s175_s28 + $0x28] sm:$0xff] %vm592_vm1, %v549_v40 }
 0x135   : > { %v569_v41 = vpop.f32.mrf.mxu2  ;;  %v589_v42 = vpop.f32.mrf.mxu3 }
 0x136   : > { %599 = vst.msk [vmem:[%s175_s28 + $0x30] sm:$0xff] %vm592_vm1, %v569_v41 }
 0x137   : > { %600 = vst.msk [vmem:[%s175_s28 + $0x38] sm:$0xff] %vm592_vm1, %v589_v42 }
 0x138 PF: > { %s13_s12 = sadd.s32 1, %s708_s12  }
 0x139   : > { %p10_p4 = scmp.ge.s32.totalorder %s13_s12, 4  }
 0x13b   :  { %12 = sbr.rel (!%p10_p4) target bundleno = 1 (0x1), region = 62 }

// kernel: laplacian_pyramid_loss.9
= control target key start
LH: loop header
LB: loop body
LE: loop exit
PB: predicated region body
PF: predicated region fallthrough
CT: control target
= control target key end

     0   :  { %s997_s21 = smov 0   ;;  %s999_s22 = smov 0   ;;  %s1181_s0 = inlined_call_operand.vmem [shape: f32[16,16,16], index: 0, kind: input, shape index: {}, may-alias: {0,1}]   ;;  %s1182_s1 = inlined_call_operand.vmem [shape: f32[16,16,16], index: 1, kind: input, shape index: {}, may-alias: {0,1}]   ;;  %s1183_s2 = inlined_call_operand.vmem [shape: f32[16,8,8], index: 2, kind: input, shape index: {}, may-alias: {2,3}]   ;;  %s1184_s3 = inlined_call_operand.vmem [shape: f32[16,8,8], index: 3, kind: input, shape index: {}, may-alias: {2,3}]   ;;  %s1185_s4 = inlined_call_operand.vmem [shape: f32[8,16], index: 4, kind: input, shape index: {}]   ;;  %s1186_s5 = inlined_call_operand.vmem [shape: f32[16,8], index: 5, kind: input, shape index: {}]   ;;  %s1187_s6 = inlined_call_operand.vmem [shape: f32[2,8,128], index: 6, kind: output, shape index: {}]  }
   0x1   :  { %s1001_s23 = smov 0  }
   0x2 LB: > { %s28_s24 = sadd.s32 1, %s956_s22  ;;  %p863_p0 = scmp.ge.s32.totalorder %s960_s23, 1  ;;  %s960_s23 = sphi %s1001_s23, %s16_s23   ;;  %s956_s22 = sphi %s999_s22, %s1189_s22   ;;  %s952_s21 = sphi %s997_s21, %s1188_s21  }
   0x3   : > { %p30_p1 = scmp.ge.s32.totalorder %s28_s24, 2  ;;  %p284_p2 = scmp.lt.s32.totalorder %s960_s23, 3 }
   0x5   : > { %s1191_s24 = smov (%p30_p1, %s28_s24), 0  ;;  %p285_p3 = pnand %p863_p0, %p284_p2 }
   0x6   : > { %s864_s27 = sshll.u32 (!%p285_p3), %s952_s21, 2  ;;  %p374_p6 = scmp.lt.s32.totalorder (!%p285_p3), %s952_s21, 1 }
   0x7   : > { %288 = sbr.rel (%p285_p3) target bundleno = 507 (0x1fb), region = 44  ;;  %p338_p4 = scmp.lt.s32.totalorder (!%p285_p3), %s864_s27, 15 }
   0x8   : > { %s891_s28 = sadd.s32 (!%p285_p3), 8, %s864_s27 }
   0x9   : > { %p348_p5 = scmp.lt.s32.totalorder (!%p285_p3), %s891_s28, 15 }
   0xc   : > { %v419_v0 = vld [vmem:[%s1185_s4] sm:$0xff]  ;;  %s1193_s27 = smov (!%p338_p4, %s864_s27), 15  ;;  %s1195_s28 = smov (!%p348_p5, %s891_s28), 15  ;;  %vm422_vm0 = vcmask 64512   ;;  %v421_v21 = vld [vmem:[%s1186_s5 + $0x8] sm:$0xff]  ;;  %vm733_vm3 = vcmask 130048  }
   0xd   : > { %441 = vmatpush.msra.mxu0 %v419_v0  ;;  %464 = vmatpush.msra.mxu1 %v419_v0  ;;  %s871_s29 = sshll.u32 %s1193_s27, 3  ;;  %s873_s9 = sshll.u32 %s1195_s28, 3  ;;  %v420_v16 = vld [vmem:[%s1186_s5] sm:$0xff] }
   0xe   : > { %487 = vmatpush.msra.mxu2 %v419_v0  ;;  %510 = vmatpush.msra.mxu3 %v419_v0  ;;  %s361_s8 = scalar_lea.vmem %s1183_s2, %s871_s29  ;;  %s370_s12 = scalar_lea.vmem %s1184_s3, %s873_s9 }
   0xf   : > { %v407_v1 = vld [vmem:[%s361_s8] sm:$0xff]  ;;  %v408_v2 = vld [vmem:[%s361_s8 + $0x8] sm:$0xff]  ;;  %v409_v3 = vld [vmem:[%s361_s8 + $0x10] sm:$0xff]  ;;  %s889_s13 = sshll.u32 %s1193_s27, 4  ;;  %s892_s14 = sshll.u32 %s1195_s28, 4 }
  0x10   : > { %v410_v4 = vld [vmem:[%s361_s8 + $0x18] sm:$0xff]  ;;  %v411_v5 = vld [vmem:[%s370_s12] sm:$0xff]  ;;  %v412_v6 = vld [vmem:[%s370_s12 + $0x8] sm:$0xff]  ;;  %s1034_s17 = scalar_lea.vmem %s1181_s0, %s889_s13  ;;  %s1039_s20 = scalar_lea.vmem %s1182_s1, %s892_s14 }
  0x11   : > { %v413_v7 = vld [vmem:[%s370_s12 + $0x10] sm:$0xff]  ;;  %v415_v8 = vsub.f32 %v407_v1, %v411_v5  ;;  %v416_v9 = vsub.f32 %v408_v2, %v412_v6  ;;  %v414_v11 = vld [vmem:[%s370_s12 + $0x18] sm:$0xff]  ;;  %v383_v13 = vld [vmem:[%s1034_s17] sm:$0xff]  ;;  %s1197_s21 = smov (!%p374_p6, %s952_s21), 1 }
  0x12   : > { %v417_v10 = vsub.f32 %v409_v3, %v413_v7  ;;  %v418_v12 = vsub.f32 %v410_v4, %v414_v11  ;;  %v391_v14 = vld [vmem:[%s1039_s20] sm:$0xff]  ;;  %v385_v22 = vld [vmem:[%s1034_s17 + $0x10] sm:$0xff]  ;;  %v384_v25 = vld [vmem:[%s1034_s17 + $0x8] sm:$0xff]  ;;  %s874_s29 = sshll.u32 %s1197_s21, 3 }
  0x13   : > { %875 = vmatmul.msk.f32.vlgmr.msra.gmra.mxu0 %vm422_vm0, %v415_v8  ;;  %876 = vmatmul.msk.f32.vlgmr.msra.gmra.mxu1 %vm422_vm0, %v416_v9  ;;  %v399_v15 = vsub.f32 %v383_v13, %v391_v14  ;;  %v393_v23 = vld [vmem:[%s1039_s20 + $0x10] sm:$0xff]  ;;  %v392_v26 = vld [vmem:[%s1039_s20 + $0x8] sm:$0xff]  ;;  %v386_v27 = vld [vmem:[%s1034_s17 + $0x18] sm:$0xff]  ;;  %s377_s9 = scalar_lea.vmem %s1187_s6, %s874_s29 }
  0x14   : > { %877 = vmatmul.msk.f32.vlgmr.msra.gmra.mxu2 %vm422_vm0, %v417_v10  ;;  %878 = vmatmul.msk.f32.vlgmr.msra.gmra.mxu3 %vm422_vm0, %v418_v12  ;;  %v401_v24 = vsub.f32 %v385_v22, %v393_v23  ;;  %v400_v28 = vsub.f32 %v384_v25, %v392_v26  ;;  %v394_v29 = vld [vmem:[%s1039_s20 + $0x18] sm:$0xff]  ;;  %v387_v31 = vld [vmem:[%s1034_s17 + $0x20] sm:$0xff]  ;;  %v389_v33 = vld [vmem:[%s1034_s17 + $0x30] sm:$0xff] }
  0x15   : > { %v402_v30 = vsub.f32 %v386_v27, %v394_v29  ;;  %v395_v32 = vld [vmem:[%s1039_s20 + $0x20] sm:$0xff]  ;;  %v397_v35 = vld [vmem:[%s1039_s20 + $0x30] sm:$0xff]  ;;  %v388_v37 = vld [vmem:[%s1034_s17 + $0x28] sm:$0xff] }
  0x16   : > { %v403_v34 = vsub.f32 %v387_v31, %v395_v32  ;;  %v405_v36 = vsub.f32 %v389_v33, %v397_v35  ;;  %v396_v38 = vld [vmem:[%s1039_s20 + $0x28] sm:$0xff]  ;;  %v390_v39 = vld [vmem:[%s1034_s17 + $0x38] sm:$0xff] }
  0x17   : > { %v404_v40 = vsub.f32 %v388_v37, %v396_v38  ;;  %v398_v41 = vld [vmem:[%s1039_s20 + $0x38] sm:$0xff] }
  0x18   : > { %v406_v42 = vsub.f32 %v390_v39, %v398_v41 }
  0x90   : > { %v443_v17 = vpop.f32.mrf.mxu0  ;;  %v466_v18 = vpop.f32.mrf.mxu1 }
  0x91   : > { %536 = vmatpush.msrb.mxu0 %v443_v17  ;;  %559 = vmatpush.msrb.mxu1 %v466_v18 }
  0x92   : > { %879 = vmatmul.msk.f32.vlgmr.msrb.gmra.mxu0 %vm422_vm0, %v420_v16  ;;  %881 = vmatmul.msk.f32.vlgmr.msrb.gmra.mxu1 %vm422_vm0, %v420_v16 }
  0x97   : > { %v489_v19 = vpop.f32.mrf.mxu2  ;;  %v512_v20 = vpop.f32.mrf.mxu3 }
  0x98   : > { %582 = vmatpush.msrb.mxu2 %v489_v19  ;;  %605 = vmatpush.msrb.mxu3 %v512_v20 }
  0x99   : > { %883 = vmatmul.msk.f32.vlgmr.msrb.gmra.mxu2 %vm422_vm0, %v420_v16  ;;  %885 = vmatmul.msk.f32.vlgmr.msrb.gmra.mxu3 %vm422_vm0, %v420_v16 }
  0x9a   : > { %880 = vmatmul.msk.f32.gmra.mxu0 %vm422_vm0, %v421_v21  ;;  %882 = vmatmul.msk.f32.gmra.mxu1 %vm422_vm0, %v421_v21 }
  0xa1   : > { %884 = vmatmul.msk.f32.gmra.mxu2 %vm422_vm0, %v421_v21  ;;  %886 = vmatmul.msk.f32.gmra.mxu3 %vm422_vm0, %v421_v21 }
 0x10f   : > { %v538_v43 = vpop.f32.mrf.mxu0  ;;  %v561_v44 = vpop.f32.mrf.mxu1 }
 0x110   : > { %v613_v45 = vsub.f32 %v399_v15, %v538_v43  ;;  %v615_v46 = vsub.f32 %v401_v24, %v561_v44 }
 0x112   : > { %v621_v47 = vmul.f32 %v613_v45, %v613_v45  ;;  %v623_v48 = vmul.f32 %v615_v46, %v615_v46 }
 0x114   : > { %v1071_v49 = vadd.f32 1e-06, %v621_v47  ;;  %v1073_v50 = vadd.f32 1e-06, %v623_v48 }
 0x116   : > { %922 = vrsqrt.f32 %v1071_v49  ;;  %vm644_vm1 = vcmp.eq.f32.partialorder %v1071_v49, inf  ;;  %vm646_vm2 = vcmp.eq.f32.partialorder %v1071_v49, 0.0  ;;  %v647_v25 = vand.u32 2147483648, %v1071_v49 }
 0x117   : > { %924 = vrsqrt.f32 %v1073_v50  ;;  %v541_v51 = vpop.f32.mrf.mxu0  ;;  %v564_v52 = vpop.f32.mrf.mxu1  ;;  %vm668_vm4 = vcmp.eq.f32.partialorder %v1073_v50, inf  ;;  %vm670_vm5 = vcmp.eq.f32.partialorder %v1073_v50, 0.0  ;;  %v671_v38 = vand.u32 2147483648, %v1073_v50 }
 0x118   : > { %v614_v53 = vsub.f32 %v400_v28, %v541_v51  ;;  %v616_v54 = vsub.f32 %v402_v30, %v564_v52 }
 0x11a   : > { %v622_v55 = vmul.f32 %v614_v53, %v614_v53  ;;  %v624_v56 = vmul.f32 %v616_v54, %v616_v54 }
 0x11c   : > { %v923_v57 = vpop.eup %922  ;;  %v1077_v58 = vadd.f32 1e-06, %v622_v55  ;;  %v1079_v59 = vadd.f32 1e-06, %v624_v56  ;;  %v584_v60 = vpop.f32.mrf.mxu2 }
 0x11d   : > { %v607_v61 = vpop.f32.mrf.mxu3  ;;  %v925_v62 = vpop.eup %924  ;;  %v638_v63 = vmul.f32 %v923_v57, %v1071_v49  ;;  %v617_v0 = vsub.f32 %v403_v34, %v584_v60 }
 0x11e   : > { %v619_v1 = vsub.f32 %v405_v36, %v607_v61  ;;  %926 = vrsqrt.f32 %v1077_v58  ;;  %v662_v5 = vmul.f32 %v925_v62, %v1073_v50  ;;  %vm656_vm6 = vcmp.eq.f32.partialorder %v1077_v58, inf }
 0x11f   : > { %928 = vrsqrt.f32 %v1079_v59  ;;  %v625_v2 = vmul.f32 %v617_v0, %v617_v0  ;;  %v639_v4 = vmul.f32 %v923_v57, %v638_v63  ;;  %vm658_vm7 = vcmp.eq.f32.partialorder %v1077_v58, 0.0 }
 0x120   : > { %v627_v3 = vmul.f32 %v619_v1, %v619_v1  ;;  %v663_v9 = vmul.f32 %v925_v62, %v662_v5  ;;  %v659_v44 = vand.u32 2147483648, %v1077_v58  ;;  %vm680_vm8 = vcmp.eq.f32.partialorder %v1079_v59, inf }
 0x121   : > { %v1085_v6 = vadd.f32 1e-06, %v625_v2  ;;  %v640_v8 = vmul.f32 0.5, %v639_v4  ;;  %vm682_vm9 = vcmp.eq.f32.partialorder %v1079_v59, 0.0  ;;  %v683_v54 = vand.u32 2147483648, %v1079_v59 }
 0x122   : > { %v1087_v7 = vadd.f32 1e-06, %v627_v3  ;;  %v664_v14 = vmul.f32 0.5, %v663_v9 }
 0x123   : > { %930 = vrsqrt.f32 %v1085_v6  ;;  %v641_v10 = vsub.f32 1.5, %v640_v8  ;;  %vm692_vm10 = vcmp.eq.f32.partialorder %v1085_v6, inf  ;;  %vm694_vm11 = vcmp.eq.f32.partialorder %v1085_v6, 0.0 }
 0x124   : > { %v927_v11 = vpop.eup %926  ;;  %932 = vrsqrt.f32 %v1087_v7  ;;  %v587_v12 = vpop.f32.mrf.mxu2  ;;  %v665_v20 = vsub.f32 1.5, %v664_v14  ;;  %vm716_vm12 = vcmp.eq.f32.partialorder %v1087_v7, inf  ;;  %vm718_vm15 = vcmp.eq.f32.partialorder %v1087_v7, 0.0 }
 0x125   : > { %v610_v13 = vpop.f32.mrf.mxu3  ;;  %v929_v15 = vpop.eup %928  ;;  %v650_v16 = vmul.f32 %v927_v11, %v1077_v58  ;;  %v618_v17 = vsub.f32 %v404_v40, %v587_v12  ;;  %v642_v19 = vmul.f32 %v923_v57, %v641_v10  ;;  %v695_v10 = vand.u32 2147483648, %v1085_v6 }
 0x126   : > { %v620_v18 = vsub.f32 %v406_v42, %v610_v13  ;;  %v674_v21 = vmul.f32 %v929_v15, %v1079_v59  ;;  %v666_v26 = vmul.f32 %v925_v62, %v665_v20 }
 0x127   : > { %v626_v22 = vmul.f32 %v618_v17, %v618_v17  ;;  %v651_v24 = vmul.f32 %v927_v11, %v650_v16  ;;  %v643_v31 = vmul.f32 %v642_v19, %v1071_v49 }
 0x128   : > { %v628_v23 = vmul.f32 %v620_v18, %v620_v18  ;;  %v675_v27 = vmul.f32 %v929_v15, %v674_v21  ;;  %v667_v34 = vmul.f32 %v666_v26, %v1073_v50 }
 0x129   : > { %v931_v28 = vpop.eup %930  ;;  %v1096_v29 = vadd.f32 1e-06, %v626_v22  ;;  %v652_v32 = vmul.f32 0.5, %v651_v24  ;;  %v645_v41 = vsel %vm644_vm1, %v1071_v49, %v643_v31  ;;  %v719_v31 = vand.u32 2147483648, %v1087_v7 }
 0x12a   : > { %v1098_v30 = vadd.f32 1e-06, %v628_v23  ;;  %v933_v33 = vpop.eup %932  ;;  %v676_v35 = vmul.f32 0.5, %v675_v27  ;;  %v686_v36 = vmul.f32 %v931_v28, %v1085_v6  ;;  %v669_v45 = vsel %vm668_vm4, %v1073_v50, %v667_v34 }
 0x12b   : > { %934 = vrsqrt.f32 %v1096_v29  ;;  %v653_v37 = vsub.f32 1.5, %v652_v32  ;;  %v710_v43 = vmul.f32 %v933_v33, %v1087_v7  ;;  %v648_v52 = vsel %vm646_vm2, %v647_v25, %v645_v41 }
 0x12c   : > { %936 = vrsqrt.f32 %v1098_v30  ;;  %v677_v39 = vsub.f32 1.5, %v676_v35  ;;  %v687_v40 = vmul.f32 %v931_v28, %v686_v36  ;;  %v672_v60 = vsel %vm670_vm5, %v671_v38, %v669_v45 }
 0x12d   : > { %v654_v42 = vmul.f32 %v927_v11, %v653_v37  ;;  %v711_v51 = vmul.f32 %v933_v33, %v710_v43  ;;  %v734_v4 = vsel %vm733_vm3, %v648_v52, 0.0  ;;  %v737_v13 = vsel %vm733_vm3, %v672_v60, 0.0 }
 0x12e   : > { %v678_v46 = vmul.f32 %v929_v15, %v677_v39  ;;  %v688_v47 = vmul.f32 0.5, %v687_v40  ;;  %vm704_vm13 = vcmp.eq.f32.partialorder %v1096_v29, inf  ;;  %vm706_vm14 = vcmp.eq.f32.partialorder %v1096_v29, 0.0 }
 0x12f   : > { %v655_v48 = vmul.f32 %v654_v42, %v1077_v58  ;;  %v712_v61 = vmul.f32 0.5, %v711_v51  ;;  %vm728_vm0 = vcmp.eq.f32.partialorder %v1098_v30, inf  ;;  %v731_v37 = vand.u32 2147483648, %v1098_v30 }
 0x130   : > { %v679_v53 = vmul.f32 %v678_v46, %v1079_v59  ;;  %v689_v55 = vsub.f32 1.5, %v688_v47  ;;  %vm730_vm1 = vcmp.eq.f32.partialorder %v1098_v30, 0.0 }
 0x131   : > { %v935_v56 = vpop.eup %934  ;;  %v657_v57 = vsel %vm656_vm6, %v1077_v58, %v655_v48  ;;  %v713_v2 = vsub.f32 1.5, %v712_v61 }
 0x132   : > { %v937_v62 = vpop.eup %936  ;;  %v660_v49 = vsel %vm658_vm7, %v659_v44, %v657_v57  ;;  %v681_v63 = vsel %vm680_vm8, %v1079_v59, %v679_v53  ;;  %v690_v0 = vmul.f32 %v931_v28, %v689_v55  ;;  %v698_v1 = vmul.f32 %v935_v56, %v1096_v29 }
 0x133   : > { %v722_v3 = vmul.f32 %v937_v62, %v1098_v30  ;;  %v735_v50 = vsel %vm733_vm3, %v660_v49, 0.0  ;;  %v684_v5 = vsel %vm682_vm9, %v683_v54, %v681_v63  ;;  %v714_v11 = vmul.f32 %v933_v33, %v713_v2 }
 0x134   : > { %v691_v8 = vmul.f32 %v690_v0, %v1085_v6  ;;  %v699_v9 = vmul.f32 %v935_v56, %v698_v1  ;;  %v736_v58 = vadd.f32 %v735_v50, %v734_v4  ;;  %v739_v18 = vsel %vm733_vm3, %v684_v5, 0.0 }
 0x135   : > { %v723_v12 = vmul.f32 %v937_v62, %v722_v3  ;;  %v715_v20 = vmul.f32 %v714_v11, %v1087_v7  ;;  %v707_v28 = vand.u32 2147483648, %v1096_v29 }
 0x136   : > { %v693_v14 = vsel %vm692_vm10, %v1085_v6, %v691_v8  ;;  %v700_v15 = vmul.f32 0.5, %v699_v9  ;;  %v738_v16 = vadd.f32 %v737_v13, %v736_v58 }
 0x137   : > { %v696_v59 = vsel %vm694_vm11, %v695_v10, %v693_v14  ;;  %v724_v17 = vmul.f32 0.5, %v723_v12  ;;  %v717_v27 = vsel %vm716_vm12, %v1087_v7, %v715_v20 }
 0x138   : > { %v701_v19 = vsub.f32 1.5, %v700_v15  ;;  %v740_v21 = vadd.f32 %v739_v18, %v738_v16  ;;  %v741_v23 = vsel %vm733_vm3, %v696_v59, 0.0  ;;  %v720_v35 = vsel %vm718_vm15, %v719_v31, %v717_v27 }
 0x139   : > { %v725_v22 = vsub.f32 1.5, %v724_v17 }
 0x13a   : > { %v702_v24 = vmul.f32 %v935_v56, %v701_v19  ;;  %v742_v25 = vadd.f32 %v741_v23, %v740_v21 }
 0x13b   : > { %v726_v26 = vmul.f32 %v937_v62, %v725_v22 }
 0x13c   : > { %v703_v6 = vmul.f32 %v702_v24, %v1096_v29 }
 0x13d   : > { %v727_v32 = vmul.f32 %v726_v26, %v1098_v30 }
 0x13e   : > { %v705_v33 = vsel %vm704_vm13, %v1096_v29, %v703_v6  ;;  %v745_v29 = vsel %vm733_vm3, %v720_v35, 0.0 }
 0x13f   : > { %v708_v34 = vsel %vm706_vm14, %v707_v28, %v705_v33  ;;  %v729_v36 = vsel %vm728_vm0, %v1098_v30, %v727_v32 }
 0x140   : > { %v743_v38 = vsel %vm733_vm3, %v708_v34, 0.0  ;;  %v732_v39 = vsel %vm730_vm1, %v731_v37, %v729_v36 }
 0x141   : > { %v744_v40 = vadd.f32 %v743_v38, %v742_v25  ;;  %v747_v7 = vsel %vm733_vm3, %v732_v39, 0.0 }
 0x143   : > { %v746_v41 = vadd.f32 %v745_v29, %v744_v40 }
 0x145   : > { %v748_v42 = vadd.f32 %v747_v7, %v746_v41 }
 0x147   : > { %749 = vadd.xlane.f32.xlu0 %v748_v42 }
 0x1ba   : > { %v750_v43 = vpop.xlane.xlu0 %749 }
 0x1bb   : > { %v751_v44 = vrot.slane %v750_v43, 4 }
 0x1bd   : > { %v752_v45 = vadd.f32 %v751_v44, %v750_v43 }
 0x1bf   : > { %v753_v46 = vrot.slane %v752_v45, 2 }
 0x1c1   : > { %v754_v47 = vadd.f32 %v753_v46, %v752_v45 }
 0x1c3   : > { %v755_v48 = vrot.slane %v754_v47, 1 }
 0x1c5   : > { %v756_v30 = vadd.f32 %v755_v48, %v754_v47 }
 0x1c7   : > { %895 = vpush %v756_v30 }
 0x1f8   : > { %s896_s30 = spop %895 }
 0x1f9   : > { %v759_v51 = vstv %s896_s30 }
 0x1fa   : > { %761 = vst [vmem:[%s377_s9] sm:$0xff] %v759_v51 }
 0x1fb PF: > { %s16_s23 = sadd.s32 1, %s960_s23   ;;  %s1188_s21 = smov %s956_s22 }
 0x1fc   : > { %p13_p7 = scmp.ge.s32.totalorder %s16_s23, 4   ;;  %s1189_s22 = smov %s1191_s24 }
 0x1fe   :  { %15 = sbr.rel (!%p13_p7) target bundleno = 2 (0x2), region = 87 }

// kernel: laplacian_pyramid_loss.7
= control target key start
LH: loop header
LB: loop body
LE: loop exit
PB: predicated region body
PF: predicated region fallthrough
CT: control target
= control target key end

     0   :  { %s660_s12 = smov 0   ;;  %s711_s0 = inlined_call_operand.vmem [shape: f32[16,8,8], index: 0, kind: input, shape index: {}]   ;;  %s712_s1 = inlined_call_operand.vmem [shape: f32[8,4], index: 1, kind: input, shape index: {}]   ;;  %s713_s2 = inlined_call_operand.vmem [shape: f32[4,8], index: 2, kind: input, shape index: {}]   ;;  %s714_s3 = inlined_call_operand.vmem [shape: f32[16,4,4], index: 3, kind: output, shape index: {}]  }
   0x1 LB: > { %s597_s13 = sadd.s32 4294967295, %s638_s12   ;;  %p601_p0 = scmp.ge.s32.totalorder %s638_s12, 1  ;;  %s638_s12 = sphi %s660_s12, %s13_s12  }
   0x2   : > { %p138_p1 = scmp.lt.s32.totalorder %s638_s12, 3 }
   0x4   : > { %p139_p2 = pnand %p601_p0, %p138_p1 }
   0x5   : > { %s602_s16 = sshll.u32 (!%p139_p2), %s597_s13, 3 }
   0x6   : > { %142 = sbr.rel (%p139_p2) target bundleno = 291 (0x123), region = 32  ;;  %p163_p3 = scmp.lt.s32.totalorder (!%p139_p2), %s602_s16, 15 }
   0xb   : > { %v182_v0 = vld [vmem:[%s712_s1] sm:$0xff]  ;;  %s716_s16 = smov (!%p163_p3, %s602_s16), 15  ;;  %vm184_vm0 = vcmask 64512   ;;  %vm532_vm1 = vcmask 27648  }
   0xc   : > { %249 = vmatpush.msra.mxu2 %v182_v0  ;;  %272 = vmatpush.msra.mxu3 %v182_v0  ;;  %s603_s17 = sshll.u32 %s716_s16, 3  ;;  %v183_v11 = vld [vmem:[%s713_s2] sm:$0xf]  ;;  %s605_s23 = sshll.u32 %s716_s16, 2 }
   0xd   : > { %203 = vmatpush.msra.mxu0 %v182_v0  ;;  %226 = vmatpush.msra.mxu1 %v182_v0  ;;  %s166_s20 = scalar_lea.vmem %s711_s0, %s603_s17  ;;  %s172_s26 = scalar_lea.vmem %s714_s3, %s605_s23 }
   0xe   : > { %341 = vmatpush.msrb.mxu2 %v182_v0  ;;  %364 = vmatpush.msrb.mxu3 %v182_v0  ;;  %v176_v1 = vld [vmem:[%s166_s20 + $0x10] sm:$0xff]  ;;  %v177_v2 = vld [vmem:[%s166_s20 + $0x18] sm:$0xff]  ;;  %v174_v3 = vld [vmem:[%s166_s20] sm:$0xff] }
   0xf   : > { %295 = vmatpush.msrb.mxu0 %v182_v0  ;;  %318 = vmatpush.msrb.mxu1 %v182_v0  ;;  %v175_v4 = vld [vmem:[%s166_s20 + $0x8] sm:$0xff]  ;;  %v180_v5 = vld [vmem:[%s166_s20 + $0x30] sm:$0xff]  ;;  %v181_v6 = vld [vmem:[%s166_s20 + $0x38] sm:$0xff] }
  0x10   : > { %608 = vmatmul.msk.f32.vlgmr.msra.gmra.mxu2 %vm184_vm0, %v176_v1  ;;  %609 = vmatmul.msk.f32.vlgmr.msra.gmra.mxu3 %vm184_vm0, %v177_v2  ;;  %v178_v7 = vld [vmem:[%s166_s20 + $0x20] sm:$0xff]  ;;  %v179_v8 = vld [vmem:[%s166_s20 + $0x28] sm:$0xff] }
  0x11   : > { %606 = vmatmul.msk.f32.vlgmr.msra.gmra.mxu0 %vm184_vm0, %v174_v3  ;;  %607 = vmatmul.msk.f32.vlgmr.msra.gmra.mxu1 %vm184_vm0, %v175_v4 }
  0x18   : > { %612 = vmatmul.msk.f32.vlgmr.msrb.gmra.mxu2 %vm184_vm0, %v180_v5  ;;  %613 = vmatmul.msk.f32.vlgmr.msrb.gmra.mxu3 %vm184_vm0, %v181_v6 }
  0x19   : > { %610 = vmatmul.msk.f32.vlgmr.msrb.gmra.mxu0 %vm184_vm0, %v178_v7  ;;  %611 = vmatmul.msk.f32.vlgmr.msrb.gmra.mxu1 %vm184_vm0, %v179_v8 }
  0x8e   : > { %v205_v9 = vpop.f32.mrf.mxu0  ;;  %v228_v10 = vpop.f32.mrf.mxu1 }
  0x8f   : > { %387 = vmatpush.msra.mxu0 %v205_v9  ;;  %407 = vmatpush.msra.mxu1 %v228_v10 }
  0x90   : > { %614 = vmatmul.msk.f32.vlgmr.msra.gmra.mxu0 %vm184_vm0, %v183_v11  ;;  %615 = vmatmul.msk.f32.vlgmr.msra.gmra.mxu1 %vm184_vm0, %v183_v11 }
  0x93   : > { %v251_v12 = vpop.f32.mrf.mxu2  ;;  %v274_v13 = vpop.f32.mrf.mxu3 }
  0x94   : > { %427 = vmatpush.msra.mxu2 %v251_v12  ;;  %447 = vmatpush.msra.mxu3 %v274_v13 }
  0x95   : > { %616 = vmatmul.msk.f32.vlgmr.msra.gmra.mxu2 %vm184_vm0, %v183_v11  ;;  %617 = vmatmul.msk.f32.vlgmr.msra.gmra.mxu3 %vm184_vm0, %v183_v11 }
  0x96   : > { %v297_v14 = vpop.f32.mrf.mxu0  ;;  %v320_v15 = vpop.f32.mrf.mxu1 }
  0x97   : > { %467 = vmatpush.msrb.mxu0 %v297_v14  ;;  %487 = vmatpush.msrb.mxu1 %v320_v15 }
  0x98   : > { %618 = vmatmul.msk.f32.vlgmr.msrb.gmra.mxu0 %vm184_vm0, %v183_v11  ;;  %619 = vmatmul.msk.f32.vlgmr.msrb.gmra.mxu1 %vm184_vm0, %v183_v11 }
  0x9b   : > { %v343_v16 = vpop.f32.mrf.mxu2  ;;  %v366_v17 = vpop.f32.mrf.mxu3 }
  0x9c   : > { %507 = vmatpush.msrb.mxu2 %v343_v16  ;;  %527 = vmatpush.msrb.mxu3 %v366_v17 }
  0x9d   : > { %620 = vmatmul.msk.f32.vlgmr.msrb.gmra.mxu2 %vm184_vm0, %v183_v11  ;;  %621 = vmatmul.msk.f32.vlgmr.msrb.gmra.mxu3 %vm184_vm0, %v183_v11 }
 0x10d   : > { %v389_v18 = vpop.f32.mrf.mxu0  ;;  %v409_v19 = vpop.f32.mrf.mxu1 }
 0x10e   : > { %533 = vst.msk [vmem:[%s172_s26] sm:$0xf] %vm532_vm1, %v389_v18 }
 0x10f   : > { %534 = vst.msk [vmem:[%s172_s26 + $0x4] sm:$0xf] %vm532_vm1, %v409_v19 }
 0x115   : > { %v469_v20 = vpop.f32.mrf.mxu0  ;;  %v489_v21 = vpop.f32.mrf.mxu1 }
 0x116   : > { %537 = vst.msk [vmem:[%s172_s26 + $0x10] sm:$0xf] %vm532_vm1, %v469_v20 }
 0x117   : > { %538 = vst.msk [vmem:[%s172_s26 + $0x14] sm:$0xf] %vm532_vm1, %v489_v21 }
 0x118   : > { %v429_v22 = vpop.f32.mrf.mxu2  ;;  %v449_v23 = vpop.f32.mrf.mxu3 }
 0x119   : > { %535 = vst.msk [vmem:[%s172_s26 + $0x8] sm:$0xf] %vm532_vm1, %v429_v22 }
 0x11a   : > { %536 = vst.msk [vmem:[%s172_s26 + $0xc] sm:$0xf] %vm532_vm1, %v449_v23 }
 0x120   : > { %v509_v24 = vpop.f32.mrf.mxu2  ;;  %v529_v25 = vpop.f32.mrf.mxu3 }
 0x121   : > { %539 = vst.msk [vmem:[%s172_s26 + $0x18] sm:$0xf] %vm532_vm1, %v509_v24 }
 0x122   : > { %540 = vst.msk [vmem:[%s172_s26 + $0x1c] sm:$0xf] %vm532_vm1, %v529_v25 }
 0x123 PF: > { %s13_s12 = sadd.s32 1, %s638_s12  }
 0x124   : > { %p10_p4 = scmp.ge.s32.totalorder %s13_s12, 4  }
 0x126   :  { %12 = sbr.rel (!%p10_p4) target bundleno = 1 (0x1), region = 62 }

// kernel: laplacian_pyramid_loss.10
= control target key start
LH: loop header
LB: loop body
LE: loop exit
PB: predicated region body
PF: predicated region fallthrough
CT: control target
= control target key end

     0   :  { %s903_s21 = smov 0   ;;  %s905_s22 = smov 0   ;;  %s976_s0 = inlined_call_operand.vmem [shape: f32[16,8,8], index: 0, kind: input, shape index: {}, may-alias: {0,1}]   ;;  %s977_s1 = inlined_call_operand.vmem [shape: f32[16,8,8], index: 1, kind: input, shape index: {}, may-alias: {0,1}]   ;;  %s978_s2 = inlined_call_operand.vmem [shape: f32[16,4,4], index: 2, kind: input, shape index: {}, may-alias: {2,3}]   ;;  %s979_s3 = inlined_call_operand.vmem [shape: f32[16,4,4], index: 3, kind: input, shape index: {}, may-alias: {2,3}]   ;;  %s980_s4 = inlined_call_operand.vmem [shape: f32[4,8], index: 4, kind: input, shape index: {}]   ;;  %s981_s5 = inlined_call_operand.vmem [shape: f32[8,4], index: 5, kind: input, shape index: {}]   ;;  %s982_s6 = inlined_call_operand.vmem [shape: f32[2,8,128], index: 6, kind: output, shape index: {}]  }
   0x1   :  { %s907_s23 = smov 0  }
   0x2 LB: > { %s28_s24 = sadd.s32 1, %s862_s22  ;;  %p777_p0 = scmp.ge.s32.totalorder %s866_s23, 1  ;;  %s866_s23 = sphi %s907_s23, %s16_s23   ;;  %s862_s22 = sphi %s905_s22, %s984_s22   ;;  %s858_s21 = sphi %s903_s21, %s983_s21  }
   0x3   : > { %p30_p1 = scmp.ge.s32.totalorder %s28_s24, 2  ;;  %p282_p2 = scmp.lt.s32.totalorder %s866_s23, 3 }
   0x5   : > { %s986_s24 = smov (%p30_p1, %s28_s24), 0  ;;  %p283_p3 = pnand %p777_p0, %p282_p2 }
   0x6   : > { %s778_s27 = sshll.u32 (!%p283_p3), %s858_s21, 2  ;;  %p368_p6 = scmp.lt.s32.totalorder (!%p283_p3), %s858_s21, 1 }
   0x7   : > { %286 = sbr.rel (%p283_p3) target bundleno = 497 (0x1f1), region = 44  ;;  %p334_p4 = scmp.lt.s32.totalorder (!%p283_p3), %s778_s27, 15 }
   0x8   : > { %s806_s28 = sadd.s32 (!%p283_p3), 8, %s778_s27 }
   0x9   : > { %p343_p5 = scmp.lt.s32.totalorder (!%p283_p3), %s806_s28, 15 }
   0xc   : > { %v401_v0 = vld [vmem:[%s980_s4] sm:$0xf]  ;;  %vm407_vm0 = vcmask 1043456   ;;  %s988_s27 = smov (!%p334_p4, %s778_s27), 15  ;;  %s990_s28 = smov (!%p343_p5, %s806_s28), 15  ;;  %vm403_vm1 = vcmask 31744  }
   0xd   : > { %787 = vmatpush.msk.msra.mxu0 %vm407_vm0, %v401_v0  ;;  %789 = vmatpush.msk.msra.mxu1 %vm407_vm0, %v401_v0  ;;  %s783_s29 = sshll.u32 %s988_s27, 2  ;;  %s785_s9 = sshll.u32 %s990_s28, 2  ;;  %v402_v16 = vld [vmem:[%s981_s5] sm:$0xff]  ;;  %vm655_vm3 = vcmask 64512  }
   0xe   : > { %791 = vmatpush.msk.msra.mxu2 %vm407_vm0, %v401_v0  ;;  %793 = vmatpush.msk.msra.mxu3 %vm407_vm0, %v401_v0  ;;  %s355_s8 = scalar_lea.vmem %s978_s2, %s783_s29  ;;  %s364_s12 = scalar_lea.vmem %s979_s3, %s785_s9 }
   0xf   : > { %v389_v1 = vld [vmem:[%s355_s8] sm:$0xf]  ;;  %v390_v2 = vld [vmem:[%s355_s8 + $0x4] sm:$0xf]  ;;  %v391_v3 = vld [vmem:[%s355_s8 + $0x8] sm:$0xf] }
  0x10   : > { %v393_v4 = vld [vmem:[%s364_s12] sm:$0xf]  ;;  %v394_v5 = vld [vmem:[%s364_s12 + $0x4] sm:$0xf]  ;;  %v395_v6 = vld [vmem:[%s364_s12 + $0x8] sm:$0xf] }
  0x11   : > { %v397_v7 = vsub.f32 %v389_v1, %v393_v4  ;;  %v398_v8 = vsub.f32 %v390_v2, %v394_v5  ;;  %v399_v9 = vsub.f32 %v391_v3, %v395_v6  ;;  %v392_v10 = vld [vmem:[%s355_s8 + $0xc] sm:$0xf]  ;;  %s779_s13 = sshll.u32 %s988_s27, 3  ;;  %s781_s14 = sshll.u32 %s990_s28, 3 }
  0x12   : > { %v396_v11 = vld [vmem:[%s364_s12 + $0xc] sm:$0xf]  ;;  %s337_s17 = scalar_lea.vmem %s976_s0, %s779_s13  ;;  %s346_s20 = scalar_lea.vmem %s977_s1, %s781_s14 }
  0x13   : > { %v400_v12 = vsub.f32 %v392_v10, %v396_v11  ;;  %788 = vmatmul.msk.f32.vlgmr.msra.gmra.mxu0 %vm403_vm1, %v397_v7  ;;  %790 = vmatmul.msk.f32.vlgmr.msra.gmra.mxu1 %vm403_vm1, %v398_v8  ;;  %v377_v13 = vld [vmem:[%s337_s17] sm:$0xff]  ;;  %v378_v21 = vld [vmem:[%s337_s17 + $0x8] sm:$0xff]  ;;  %v379_v24 = vld [vmem:[%s337_s17 + $0x10] sm:$0xff]  ;;  %s992_s21 = smov (!%p368_p6, %s858_s21), 1 }
  0x14   : > { %792 = vmatmul.msk.f32.vlgmr.msra.gmra.mxu2 %vm403_vm1, %v399_v9  ;;  %v381_v14 = vld [vmem:[%s346_s20] sm:$0xff]  ;;  %v382_v22 = vld [vmem:[%s346_s20 + $0x8] sm:$0xff]  ;;  %v383_v25 = vld [vmem:[%s346_s20 + $0x10] sm:$0xff]  ;;  %s786_s27 = sshll.u32 %s992_s21, 3 }
  0x15   : > { %794 = vmatmul.msk.f32.vlgmr.msra.gmra.mxu3 %vm403_vm1, %v400_v12  ;;  %v385_v15 = vsub.f32 %v377_v13, %v381_v14  ;;  %v386_v23 = vsub.f32 %v378_v21, %v382_v22  ;;  %v387_v26 = vsub.f32 %v379_v24, %v383_v25  ;;  %v380_v27 = vld [vmem:[%s337_s17 + $0x18] sm:$0xff]  ;;  %s371_s7 = scalar_lea.vmem %s982_s6, %s786_s27 }
  0x16   : > { %v384_v28 = vld [vmem:[%s346_s20 + $0x18] sm:$0xff] }
  0x17   : > { %v388_v29 = vsub.f32 %v380_v27, %v384_v28 }
  0x90   : > { %v428_v17 = vpop.f32.mrf.mxu0  ;;  %v451_v18 = vpop.f32.mrf.mxu1 }
  0x91   : > { %795 = vmatpush.msk.msrb.mxu0 %vm407_vm0, %v428_v17  ;;  %797 = vmatpush.msk.msrb.mxu1 %vm407_vm0, %v451_v18 }
  0x92   : > { %796 = vmatmul.msk.f32.vlgmr.msrb.gmra.mxu0 %vm403_vm1, %v402_v16  ;;  %798 = vmatmul.msk.f32.vlgmr.msrb.gmra.mxu1 %vm403_vm1, %v402_v16 }
  0x97   : > { %v474_v19 = vpop.f32.mrf.mxu2 }
  0x98   : > { %v497_v20 = vpop.f32.mrf.mxu3  ;;  %799 = vmatpush.msk.msrb.mxu2 %vm407_vm0, %v474_v19 }
  0x99   : > { %801 = vmatpush.msk.msrb.mxu3 %vm407_vm0, %v497_v20  ;;  %800 = vmatmul.msk.f32.vlgmr.msrb.gmra.mxu2 %vm403_vm1, %v402_v16 }
  0x9a   : > { %802 = vmatmul.msk.f32.vlgmr.msrb.gmra.mxu3 %vm403_vm1, %v402_v16 }
 0x10f   : > { %v523_v30 = vpop.f32.mrf.mxu0  ;;  %v546_v31 = vpop.f32.mrf.mxu1 }
 0x110   : > { %v595_v32 = vsub.f32 %v385_v15, %v523_v30  ;;  %v596_v33 = vsub.f32 %v386_v23, %v546_v31 }
 0x112   : > { %v599_v34 = vmul.f32 %v595_v32, %v595_v32  ;;  %v600_v35 = vmul.f32 %v596_v33, %v596_v33 }
 0x114   : > { %v603_v36 = vadd.f32 1e-06, %v599_v34  ;;  %v604_v37 = vadd.f32 1e-06, %v600_v35 }
 0x116   : > { %836 = vrsqrt.f32 %v603_v36  ;;  %vm614_vm2 = vcmp.eq.f32.partialorder %v603_v36, inf  ;;  %v617_v59 = vand.u32 2147483648, %v603_v36  ;;  %vm616_vm4 = vcmp.eq.f32.partialorder %v603_v36, 0.0 }
 0x117   : > { %838 = vrsqrt.f32 %v604_v37  ;;  %vm626_vm5 = vcmp.eq.f32.partialorder %v604_v37, inf  ;;  %v629_v63 = vand.u32 2147483648, %v604_v37  ;;  %vm628_vm6 = vcmp.eq.f32.partialorder %v604_v37, 0.0 }
 0x11c   : > { %v837_v38 = vpop.eup %836  ;;  %v569_v39 = vpop.f32.mrf.mxu2 }
 0x11d   : > { %v592_v40 = vpop.f32.mrf.mxu3  ;;  %v839_v41 = vpop.eup %838  ;;  %v597_v42 = vsub.f32 %v387_v26, %v569_v39  ;;  %v608_v44 = vmul.f32 %v837_v38, %v603_v36 }
 0x11e   : > { %v598_v43 = vsub.f32 %v388_v29, %v592_v40  ;;  %v620_v45 = vmul.f32 %v839_v41, %v604_v37 }
 0x11f   : > { %v601_v46 = vmul.f32 %v597_v42, %v597_v42  ;;  %v609_v48 = vmul.f32 %v837_v38, %v608_v44 }
 0x120   : > { %v602_v47 = vmul.f32 %v598_v43, %v598_v43  ;;  %v621_v49 = vmul.f32 %v839_v41, %v620_v45 }
 0x121   : > { %v605_v50 = vadd.f32 1e-06, %v601_v46  ;;  %v610_v52 = vmul.f32 0.5, %v609_v48 }
 0x122   : > { %v606_v51 = vadd.f32 1e-06, %v602_v47  ;;  %v622_v53 = vmul.f32 0.5, %v621_v49 }
 0x123   : > { %840 = vrsqrt.f32 %v605_v50  ;;  %v611_v54 = vsub.f32 1.5, %v610_v52  ;;  %vm638_vm7 = vcmp.eq.f32.partialorder %v605_v50, inf  ;;  %v641_v18 = vand.u32 2147483648, %v605_v50 }
 0x124   : > { %842 = vrsqrt.f32 %v606_v51  ;;  %v623_v55 = vsub.f32 1.5, %v622_v53  ;;  %vm640_vm8 = vcmp.eq.f32.partialorder %v605_v50, 0.0  ;;  %vm650_vm9 = vcmp.eq.f32.partialorder %v606_v51, inf }
 0x125   : > { %v612_v56 = vmul.f32 %v837_v38, %v611_v54  ;;  %v653_v21 = vand.u32 2147483648, %v606_v51  ;;  %vm652_vm10 = vcmp.eq.f32.partialorder %v606_v51, 0.0 }
 0x126   : > { %v624_v57 = vmul.f32 %v839_v41, %v623_v55 }
 0x127   : > { %v613_v58 = vmul.f32 %v612_v56, %v603_v36 }
 0x128   : > { %v625_v60 = vmul.f32 %v624_v57, %v604_v37 }
 0x129   : > { %v841_v61 = vpop.eup %840  ;;  %v615_v62 = vsel %vm614_vm2, %v603_v36, %v613_v58 }
 0x12a   : > { %v843_v0 = vpop.eup %842  ;;  %v618_v1 = vsel %vm616_vm4, %v617_v59, %v615_v62  ;;  %v627_v2 = vsel %vm626_vm5, %v604_v37, %v625_v60  ;;  %v632_v3 = vmul.f32 %v841_v61, %v605_v50 }
 0x12b   : > { %v630_v4 = vsel %vm628_vm6, %v629_v63, %v627_v2  ;;  %v644_v5 = vmul.f32 %v843_v0, %v606_v51  ;;  %v656_v6 = vsel %vm655_vm3, %v618_v1, 0.0 }
 0x12c   : > { %v633_v7 = vmul.f32 %v841_v61, %v632_v3  ;;  %v657_v8 = vsel %vm655_vm3, %v630_v4, 0.0 }
 0x12d   : > { %v645_v9 = vmul.f32 %v843_v0, %v644_v5  ;;  %v658_v10 = vadd.f32 %v657_v8, %v656_v6 }
 0x12e   : > { %v634_v11 = vmul.f32 0.5, %v633_v7 }
 0x12f   : > { %v646_v12 = vmul.f32 0.5, %v645_v9 }
 0x130   : > { %v635_v13 = vsub.f32 1.5, %v634_v11 }
 0x131   : > { %v647_v14 = vsub.f32 1.5, %v646_v12 }
 0x132   : > { %v636_v15 = vmul.f32 %v841_v61, %v635_v13 }
 0x133   : > { %v648_v16 = vmul.f32 %v843_v0, %v647_v14 }
 0x134   : > { %v637_v17 = vmul.f32 %v636_v15, %v605_v50 }
 0x135   : > { %v649_v19 = vmul.f32 %v648_v16, %v606_v51 }
 0x136   : > { %v639_v20 = vsel %vm638_vm7, %v605_v50, %v637_v17 }
 0x137   : > { %v642_v22 = vsel %vm640_vm8, %v641_v18, %v639_v20  ;;  %v651_v23 = vsel %vm650_vm9, %v606_v51, %v649_v19 }
 0x138   : > { %v654_v24 = vsel %vm652_vm10, %v653_v21, %v651_v23  ;;  %v659_v25 = vsel %vm655_vm3, %v642_v22, 0.0 }
 0x139   : > { %v660_v26 = vadd.f32 %v659_v25, %v658_v10  ;;  %v661_v27 = vsel %vm655_vm3, %v654_v24, 0.0 }
 0x13b   : > { %v662_v28 = vadd.f32 %v661_v27, %v660_v26 }
 0x13d   : > { %663 = vadd.xlane.f32.xlu0 %v662_v28 }
 0x1b0   : > { %v664_v29 = vpop.xlane.xlu0 %663 }
 0x1b1   : > { %v665_v30 = vrot.slane %v664_v29, 4 }
 0x1b3   : > { %v666_v31 = vadd.f32 %v665_v30, %v664_v29 }
 0x1b5   : > { %v667_v32 = vrot.slane %v666_v31, 2 }
 0x1b7   : > { %v668_v33 = vadd.f32 %v667_v32, %v666_v31 }
 0x1b9   : > { %v669_v34 = vrot.slane %v668_v33, 1 }
 0x1bb   : > { %v670_v35 = vadd.f32 %v669_v34, %v668_v33 }
 0x1bd   : > { %809 = vpush %v670_v35 }
 0x1ee   : > { %s810_s28 = spop %809 }
 0x1ef   : > { %v673_v36 = vstv %s810_s28 }
 0x1f0   : > { %675 = vst [vmem:[%s371_s7] sm:$0xff] %v673_v36 }
 0x1f1 PF: > { %s16_s23 = sadd.s32 1, %s866_s23   ;;  %s983_s21 = smov %s862_s22 }
 0x1f2   : > { %p13_p7 = scmp.ge.s32.totalorder %s16_s23, 4   ;;  %s984_s22 = smov %s986_s24 }
 0x1f4   :  { %15 = sbr.rel (!%p13_p7) target bundleno = 2 (0x2), region = 87 }

// kernel: laplacian_pyramid_loss.8
= control target key start
LH: loop header
LB: loop body
LE: loop exit
PB: predicated region body
PF: predicated region fallthrough
CT: control target
= control target key end

     0   :  { %s704_s12 = smov 0   ;;  %s771_s0 = inlined_call_operand.vmem [shape: f32[16,4,4], index: 0, kind: input, shape index: {}]   ;;  %s772_s1 = inlined_call_operand.vmem [shape: f32[4,2], index: 1, kind: input, shape index: {}]   ;;  %s773_s2 = inlined_call_operand.vmem [shape: f32[2,4], index: 2, kind: input, shape index: {}]   ;;  %s774_s3 = inlined_call_operand.vmem [shape: f32[16,2,2], index: 3, kind: output, shape index: {}]  }
   0x1 LB: > { %s625_s13 = sadd.s32 4294967295, %s682_s12   ;;  %p629_p0 = scmp.ge.s32.totalorder %s682_s12, 1  ;;  %s682_s12 = sphi %s704_s12, %s13_s12  }
   0x2   : > { %p138_p1 = scmp.lt.s32.totalorder %s682_s12, 3 }
   0x4   : > { %p139_p2 = pnand %p629_p0, %p138_p1 }
   0x5   : > { %s630_s16 = sshll.u32 (!%p139_p2), %s625_s13, 3 }
   0x6   : > { %142 = sbr.rel (%p139_p2) target bundleno = 291 (0x123), region = 32  ;;  %p163_p3 = scmp.lt.s32.totalorder (!%p139_p2), %s630_s16, 15 }
   0xb   : > { %v182_v0 = vld [vmem:[%s772_s1] sm:$0xf]  ;;  %vm188_vm0 = vcmask 1043456   ;;  %s776_s16 = smov (!%p163_p3, %s630_s16), 15  ;;  %vm184_vm1 = vcmask 31744   ;;  %vm560_vm2 = vcmask 9216  }
   0xc   : > { %638 = vmatpush.msk.msra.mxu2 %vm188_vm0, %v182_v0  ;;  %640 = vmatpush.msk.msra.mxu3 %vm188_vm0, %v182_v0  ;;  %s631_s17 = sshll.u32 %s776_s16, 2  ;;  %v183_v11 = vld [vmem:[%s773_s2] sm:$0x3]  ;;  %s633_s23 = sshll.u32 %s776_s16, 1 }
   0xd   : > { %634 = vmatpush.msk.msra.mxu0 %vm188_vm0, %v182_v0  ;;  %636 = vmatpush.msk.msra.mxu1 %vm188_vm0, %v182_v0  ;;  %s166_s20 = scalar_lea.vmem %s771_s0, %s631_s17  ;;  %s172_s26 = scalar_lea.vmem %s774_s3, %s633_s23 }
   0xe   : > { %646 = vmatpush.msk.msrb.mxu2 %vm188_vm0, %v182_v0  ;;  %648 = vmatpush.msk.msrb.mxu3 %vm188_vm0, %v182_v0  ;;  %v176_v1 = vld [vmem:[%s166_s20 + $0x8] sm:$0xf]  ;;  %v177_v2 = vld [vmem:[%s166_s20 + $0xc] sm:$0xf]  ;;  %v174_v3 = vld [vmem:[%s166_s20] sm:$0xf] }
   0xf   : > { %642 = vmatpush.msk.msrb.mxu0 %vm188_vm0, %v182_v0  ;;  %644 = vmatpush.msk.msrb.mxu1 %vm188_vm0, %v182_v0  ;;  %v175_v4 = vld [vmem:[%s166_s20 + $0x4] sm:$0xf]  ;;  %v180_v5 = vld [vmem:[%s166_s20 + $0x18] sm:$0xf]  ;;  %v181_v6 = vld [vmem:[%s166_s20 + $0x1c] sm:$0xf] }
  0x10   : > { %639 = vmatmul.msk.f32.vlgmr.msra.gmra.mxu2 %vm184_vm1, %v176_v1  ;;  %641 = vmatmul.msk.f32.vlgmr.msra.gmra.mxu3 %vm184_vm1, %v177_v2  ;;  %v178_v7 = vld [vmem:[%s166_s20 + $0x10] sm:$0xf]  ;;  %v179_v8 = vld [vmem:[%s166_s20 + $0x14] sm:$0xf] }
  0x11   : > { %635 = vmatmul.msk.f32.vlgmr.msra.gmra.mxu0 %vm184_vm1, %v174_v3  ;;  %637 = vmatmul.msk.f32.vlgmr.msra.gmra.mxu1 %vm184_vm1, %v175_v4 }
  0x18   : > { %647 = vmatmul.msk.f32.vlgmr.msrb.gmra.mxu2 %vm184_vm1, %v180_v5  ;;  %649 = vmatmul.msk.f32.vlgmr.msrb.gmra.mxu3 %vm184_vm1, %v181_v6 }
  0x19   : > { %643 = vmatmul.msk.f32.vlgmr.msrb.gmra.mxu0 %vm184_vm1, %v178_v7  ;;  %645 = vmatmul.msk.f32.vlgmr.msrb.gmra.mxu1 %vm184_vm1, %v179_v8 }
  0x8e   : > { %v209_v9 = vpop.f32.mrf.mxu0  ;;  %v232_v10 = vpop.f32.mrf.mxu1 }
  0x8f   : > { %650 = vmatpush.msk.msra.mxu0 %vm188_vm0, %v209_v9  ;;  %652 = vmatpush.msk.msra.mxu1 %vm188_vm0, %v232_v10 }
  0x90   : > { %651 = vmatmul.msk.f32.vlgmr.msra.gmra.mxu0 %vm184_vm1, %v183_v11  ;;  %653 = vmatmul.msk.f32.vlgmr.msra.gmra.mxu1 %vm184_vm1, %v183_v11 }
  0x93   : > { %v255_v12 = vpop.f32.mrf.mxu2  ;;  %v278_v13 = vpop.f32.mrf.mxu3 }
  0x94   : > { %654 = vmatpush.msk.msra.mxu2 %vm188_vm0, %v255_v12  ;;  %656 = vmatpush.msk.msra.mxu3 %vm188_vm0, %v278_v13 }
  0x95   : > { %655 = vmatmul.msk.f32.vlgmr.msra.gmra.mxu2 %vm184_vm1, %v183_v11  ;;  %657 = vmatmul.msk.f32.vlgmr.msra.gmra.mxu3 %vm184_vm1, %v183_v11 }
  0x96   : > { %v301_v14 = vpop.f32.mrf.mxu0  ;;  %v324_v15 = vpop.f32.mrf.mxu1 }
  0x97   : > { %658 = vmatpush.msk.msrb.mxu0 %vm188_vm0, %v301_v14  ;;  %660 = vmatpush.msk.msrb.mxu1 %vm188_vm0, %v324_v15 }
  0x98   : > { %659 = vmatmul.msk.f32.vlgmr.msrb.gmra.mxu0 %vm184_vm1, %v183_v11  ;;  %661 = vmatmul.msk.f32.vlgmr.msrb.gmra.mxu1 %vm184_vm1, %v183_v11 }
  0x9b   : > { %v347_v16 = vpop.f32.mrf.mxu2  ;;  %v370_v17 = vpop.f32.mrf.mxu3 }
  0x9c   : > { %662 = vmatpush.msk.msrb.mxu2 %vm188_vm0, %v347_v16  ;;  %664 = vmatpush.msk.msrb.mxu3 %vm188_vm0, %v370_v17 }
  0x9d   : > { %663 = vmatmul.msk.f32.vlgmr.msrb.gmra.mxu2 %vm184_vm1, %v183_v11  ;;  %665 = vmatmul.msk.f32.vlgmr.msrb.gmra.mxu3 %vm184_vm1, %v183_v11 }
 0x10d   : > { %v396_v18 = vpop.f32.mrf.mxu0  ;;  %v419_v19 = vpop.f32.mrf.mxu1 }
 0x10e   : > { %561 = vst.msk [vmem:[%s172_s26] sm:$0x3] %vm560_vm2, %v396_v18 }
 0x10f   : > { %562 = vst.msk [vmem:[%s172_s26 + $0x2] sm:$0x3] %vm560_vm2, %v419_v19 }
 0x115   : > { %v488_v20 = vpop.f32.mrf.mxu0  ;;  %v511_v21 = vpop.f32.mrf.mxu1 }
 0x116   : > { %565 = vst.msk [vmem:[%s172_s26 + $0x8] sm:$0x3] %vm560_vm2, %v488_v20 }
 0x117   : > { %566 = vst.msk [vmem:[%s172_s26 + $0xa] sm:$0x3] %vm560_vm2, %v511_v21 }
 0x118   : > { %v442_v22 = vpop.f32.mrf.mxu2  ;;  %v465_v23 = vpop.f32.mrf.mxu3 }
 0x119   : > { %563 = vst.msk [vmem:[%s172_s26 + $0x4] sm:$0x3] %vm560_vm2, %v442_v22 }
 0x11a   : > { %564 = vst.msk [vmem:[%s172_s26 + $0x6] sm:$0x3] %vm560_vm2, %v465_v23 }
 0x120   : > { %v534_v24 = vpop.f32.mrf.mxu2  ;;  %v557_v25 = vpop.f32.mrf.mxu3 }
 0x121   : > { %567 = vst.msk [vmem:[%s172_s26 + $0xc] sm:$0x3] %vm560_vm2, %v534_v24 }
 0x122   : > { %568 = vst.msk [vmem:[%s172_s26 + $0xe] sm:$0x3] %vm560_vm2, %v557_v25 }
 0x123 PF: > { %s13_s12 = sadd.s32 1, %s682_s12  }
 0x124   : > { %p10_p4 = scmp.ge.s32.totalorder %s13_s12, 4  }
 0x126   :  { %12 = sbr.rel (!%p10_p4) target bundleno = 1 (0x1), region = 62 }

// kernel: laplacian_pyramid_loss.11
= control target key start
LH: loop header
LB: loop body
LE: loop exit
PB: predicated region body
PF: predicated region fallthrough
CT: control target
= control target key end

     0   :  { %s903_s21 = smov 0   ;;  %s905_s22 = smov 0   ;;  %s976_s0 = inlined_call_operand.vmem [shape: f32[16,4,4], index: 0, kind: input, shape index: {}, may-alias: {0,1}]   ;;  %s977_s1 = inlined_call_operand.vmem [shape: f32[16,4,4], index: 1, kind: input, shape index: {}, may-alias: {0,1}]   ;;  %s978_s2 = inlined_call_operand.vmem [shape: f32[16,2,2], index: 2, kind: input, shape index: {}, may-alias: {2,3}]   ;;  %s979_s3 = inlined_call_operand.vmem [shape: f32[16,2,2], index: 3, kind: input, shape index: {}, may-alias: {2,3}]   ;;  %s980_s4 = inlined_call_operand.vmem [shape: f32[2,4], index: 4, kind: input, shape index: {}]   ;;  %s981_s5 = inlined_call_operand.vmem [shape: f32[4,2], index: 5, kind: input, shape index: {}]   ;;  %s982_s6 = inlined_call_operand.vmem [shape: f32[2,8,128], index: 6, kind: output, shape index: {}]  }
   0x1   :  { %s907_s23 = smov 0  }
   0x2 LB: > { %s28_s24 = sadd.s32 1, %s862_s22  ;;  %p777_p0 = scmp.ge.s32.totalorder %s866_s23, 1  ;;  %s866_s23 = sphi %s907_s23, %s16_s23   ;;  %s862_s22 = sphi %s905_s22, %s984_s22   ;;  %s858_s21 = sphi %s903_s21, %s983_s21  }
   0x3   : > { %p30_p1 = scmp.ge.s32.totalorder %s28_s24, 2  ;;  %p282_p2 = scmp.lt.s32.totalorder %s866_s23, 3 }
   0x5   : > { %s986_s24 = smov (%p30_p1, %s28_s24), 0  ;;  %p283_p3 = pnand %p777_p0, %p282_p2 }
   0x6   : > { %s778_s27 = sshll.u32 (!%p283_p3), %s858_s21, 2  ;;  %p368_p6 = scmp.lt.s32.totalorder (!%p283_p3), %s858_s21, 1 }
   0x7   : > { %286 = sbr.rel (%p283_p3) target bundleno = 497 (0x1f1), region = 44  ;;  %p334_p4 = scmp.lt.s32.totalorder (!%p283_p3), %s778_s27, 15 }
   0x8   : > { %s806_s28 = sadd.s32 (!%p283_p3), 8, %s778_s27 }
   0x9   : > { %p343_p5 = scmp.lt.s32.totalorder (!%p283_p3), %s806_s28, 15 }
   0xc   : > { %v401_v0 = vld [vmem:[%s980_s4] sm:$0x3]  ;;  %vm407_vm0 = vcmask 1041408   ;;  %s988_s27 = smov (!%p334_p4, %s778_s27), 15  ;;  %s990_s28 = smov (!%p343_p5, %s806_s28), 15  ;;  %vm403_vm1 = vcmask 15360  }
   0xd   : > { %787 = vmatpush.msk.msra.mxu0 %vm407_vm0, %v401_v0  ;;  %789 = vmatpush.msk.msra.mxu1 %vm407_vm0, %v401_v0  ;;  %s783_s29 = sshll.u32 %s988_s27, 1  ;;  %s785_s9 = sshll.u32 %s990_s28, 1  ;;  %v402_v16 = vld [vmem:[%s981_s5] sm:$0xf]  ;;  %vm655_vm3 = vcmask 27648  }
   0xe   : > { %791 = vmatpush.msk.msra.mxu2 %vm407_vm0, %v401_v0  ;;  %793 = vmatpush.msk.msra.mxu3 %vm407_vm0, %v401_v0  ;;  %s355_s8 = scalar_lea.vmem %s978_s2, %s783_s29  ;;  %s364_s12 = scalar_lea.vmem %s979_s3, %s785_s9 }
   0xf   : > { %v389_v1 = vld [vmem:[%s355_s8] sm:$0x3]  ;;  %v390_v2 = vld [vmem:[%s355_s8 + $0x2] sm:$0x3]  ;;  %v391_v3 = vld [vmem:[%s355_s8 + $0x4] sm:$0x3] }
  0x10   : > { %v393_v4 = vld [vmem:[%s364_s12] sm:$0x3]  ;;  %v394_v5 = vld [vmem:[%s364_s12 + $0x2] sm:$0x3]  ;;  %v395_v6 = vld [vmem:[%s364_s12 + $0x4] sm:$0x3] }
  0x11   : > { %v397_v7 = vsub.f32 %v389_v1, %v393_v4  ;;  %v398_v8 = vsub.f32 %v390_v2, %v394_v5  ;;  %v399_v9 = vsub.f32 %v391_v3, %v395_v6  ;;  %v392_v10 = vld [vmem:[%s355_s8 + $0x6] sm:$0x3]  ;;  %s779_s13 = sshll.u32 %s988_s27, 2  ;;  %s781_s14 = sshll.u32 %s990_s28, 2 }
  0x12   : > { %v396_v11 = vld [vmem:[%s364_s12 + $0x6] sm:$0x3]  ;;  %s337_s17 = scalar_lea.vmem %s976_s0, %s779_s13  ;;  %s346_s20 = scalar_lea.vmem %s977_s1, %s781_s14 }
  0x13   : > { %v400_v12 = vsub.f32 %v392_v10, %v396_v11  ;;  %788 = vmatmul.msk.f32.vlgmr.msra.gmra.mxu0 %vm403_vm1, %v397_v7  ;;  %790 = vmatmul.msk.f32.vlgmr.msra.gmra.mxu1 %vm403_vm1, %v398_v8  ;;  %v377_v13 = vld [vmem:[%s337_s17] sm:$0xf]  ;;  %v378_v21 = vld [vmem:[%s337_s17 + $0x4] sm:$0xf]  ;;  %v379_v24 = vld [vmem:[%s337_s17 + $0x8] sm:$0xf] }
  0x14   : > { %792 = vmatmul.msk.f32.vlgmr.msra.gmra.mxu2 %vm403_vm1, %v399_v9  ;;  %v381_v14 = vld [vmem:[%s346_s20] sm:$0xf]  ;;  %v382_v22 = vld [vmem:[%s346_s20 + $0x4] sm:$0xf]  ;;  %v383_v25 = vld [vmem:[%s346_s20 + $0x8] sm:$0xf] }
  0x15   : > { %794 = vmatmul.msk.f32.vlgmr.msra.gmra.mxu3 %vm403_vm1, %v400_v12  ;;  %v385_v15 = vsub.f32 %v377_v13, %v381_v14  ;;  %v386_v23 = vsub.f32 %v378_v21, %v382_v22  ;;  %v387_v26 = vsub.f32 %v379_v24, %v383_v25  ;;  %v380_v27 = vld [vmem:[%s337_s17 + $0xc] sm:$0xf]  ;;  %s992_s21 = smov (!%p368_p6, %s858_s21), 1 }
  0x16   : > { %v384_v28 = vld [vmem:[%s346_s20 + $0xc] sm:$0xf]  ;;  %s786_s27 = sshll.u32 %s992_s21, 3 }
  0x17   : > { %v388_v29 = vsub.f32 %v380_v27, %v384_v28  ;;  %s371_s7 = scalar_lea.vmem %s982_s6, %s786_s27 }
  0x90   : > { %v428_v17 = vpop.f32.mrf.mxu0  ;;  %v451_v18 = vpop.f32.mrf.mxu1 }
  0x91   : > { %795 = vmatpush.msk.msrb.mxu0 %vm407_vm0, %v428_v17  ;;  %797 = vmatpush.msk.msrb.mxu1 %vm407_vm0, %v451_v18 }
  0x92   : > { %796 = vmatmul.msk.f32.vlgmr.msrb.gmra.mxu0 %vm403_vm1, %v402_v16  ;;  %798 = vmatmul.msk.f32.vlgmr.msrb.gmra.mxu1 %vm403_vm1, %v402_v16 }
  0x97   : > { %v474_v19 = vpop.f32.mrf.mxu2 }
  0x98   : > { %v497_v20 = vpop.f32.mrf.mxu3  ;;  %799 = vmatpush.msk.msrb.mxu2 %vm407_vm0, %v474_v19 }
  0x99   : > { %801 = vmatpush.msk.msrb.mxu3 %vm407_vm0, %v497_v20  ;;  %800 = vmatmul.msk.f32.vlgmr.msrb.gmra.mxu2 %vm403_vm1, %v402_v16 }
  0x9a   : > { %802 = vmatmul.msk.f32.vlgmr.msrb.gmra.mxu3 %vm403_vm1, %v402_v16 }
 0x10f   : > { %v523_v30 = vpop.f32.mrf.mxu0  ;;  %v546_v31 = vpop.f32.mrf.mxu1 }
 0x110   : > { %v595_v32 = vsub.f32 %v385_v15, %v523_v30  ;;  %v596_v33 = vsub.f32 %v386_v23, %v546_v31 }
 0x112   : > { %v599_v34 = vmul.f32 %v595_v32, %v595_v32  ;;  %v600_v35 = vmul.f32 %v596_v33, %v596_v33 }
 0x114   : > { %v603_v36 = vadd.f32 1e-06, %v599_v34  ;;  %v604_v37 = vadd.f32 1e-06, %v600_v35 }
 0x116   : > { %836 = vrsqrt.f32 %v603_v36  ;;  %vm614_vm2 = vcmp.eq.f32.partialorder %v603_v36, inf  ;;  %v617_v59 = vand.u32 2147483648, %v603_v36  ;;  %vm616_vm4 = vcmp.eq.f32.partialorder %v603_v36, 0.0 }
 0x117   : > { %838 = vrsqrt.f32 %v604_v37  ;;  %vm626_vm5 = vcmp.eq.f32.partialorder %v604_v37, inf  ;;  %v629_v63 = vand.u32 2147483648, %v604_v37  ;;  %vm628_vm6 = vcmp.eq.f32.partialorder %v604_v37, 0.0 }
 0x11c   : > { %v837_v38 = vpop.eup %836  ;;  %v569_v39 = vpop.f32.mrf.mxu2 }
 0x11d   : > { %v592_v40 = vpop.f32.mrf.mxu3  ;;  %v839_v41 = vpop.eup %838  ;;  %v597_v42 = vsub.f32 %v387_v26, %v569_v39  ;;  %v608_v44 = vmul.f32 %v837_v38, %v603_v36 }
 0x11e   : > { %v598_v43 = vsub.f32 %v388_v29, %v592_v40  ;;  %v620_v45 = vmul.f32 %v839_v41, %v604_v37 }
 0x11f   : > { %v601_v46 = vmul.f32 %v597_v42, %v597_v42  ;;  %v609_v48 = vmul.f32 %v837_v38, %v608_v44 }
 0x120   : > { %v602_v47 = vmul.f32 %v598_v43, %v598_v43  ;;  %v621_v49 = vmul.f32 %v839_v41, %v620_v45 }
 0x121   : > { %v605_v50 = vadd.f32 1e-06, %v601_v46  ;;  %v610_v52 = vmul.f32 0.5, %v609_v48 }
 0x122   : > { %v606_v51 = vadd.f32 1e-06, %v602_v47  ;;  %v622_v53 = vmul.f32 0.5, %v621_v49 }
 0x123   : > { %840 = vrsqrt.f32 %v605_v50  ;;  %v611_v54 = vsub.f32 1.5, %v610_v52  ;;  %vm638_vm7 = vcmp.eq.f32.partialorder %v605_v50, inf  ;;  %v641_v18 = vand.u32 2147483648, %v605_v50 }
 0x124   : > { %842 = vrsqrt.f32 %v606_v51  ;;  %v623_v55 = vsub.f32 1.5, %v622_v53  ;;  %vm640_vm8 = vcmp.eq.f32.partialorder %v605_v50, 0.0  ;;  %vm650_vm9 = vcmp.eq.f32.partialorder %v606_v51, inf }
 0x125   : > { %v612_v56 = vmul.f32 %v837_v38, %v611_v54  ;;  %v653_v21 = vand.u32 2147483648, %v606_v51  ;;  %vm652_vm10 = vcmp.eq.f32.partialorder %v606_v51, 0.0 }
 0x126   : > { %v624_v57 = vmul.f32 %v839_v41, %v623_v55 }
 0x127   : > { %v613_v58 = vmul.f32 %v612_v56, %v603_v36 }
 0x128   : > { %v625_v60 = vmul.f32 %v624_v57, %v604_v37 }
 0x129   : > { %v841_v61 = vpop.eup %840  ;;  %v615_v62 = vsel %vm614_vm2, %v603_v36, %v613_v58 }
 0x12a   : > { %v843_v0 = vpop.eup %842  ;;  %v618_v1 = vsel %vm616_vm4, %v617_v59, %v615_v62  ;;  %v627_v2 = vsel %vm626_vm5, %v604_v37, %v625_v60  ;;  %v632_v3 = vmul.f32 %v841_v61, %v605_v50 }
 0x12b   : > { %v630_v4 = vsel %vm628_vm6, %v629_v63, %v627_v2  ;;  %v644_v5 = vmul.f32 %v843_v0, %v606_v51  ;;  %v656_v6 = vsel %vm655_vm3, %v618_v1, 0.0 }
 0x12c   : > { %v633_v7 = vmul.f32 %v841_v61, %v632_v3  ;;  %v657_v8 = vsel %vm655_vm3, %v630_v4, 0.0 }
 0x12d   : > { %v645_v9 = vmul.f32 %v843_v0, %v644_v5  ;;  %v658_v10 = vadd.f32 %v657_v8, %v656_v6 }
 0x12e   : > { %v634_v11 = vmul.f32 0.5, %v633_v7 }
 0x12f   : > { %v646_v12 = vmul.f32 0.5, %v645_v9 }
 0x130   : > { %v635_v13 = vsub.f32 1.5, %v634_v11 }
 0x131   : > { %v647_v14 = vsub.f32 1.5, %v646_v12 }
 0x132   : > { %v636_v15 = vmul.f32 %v841_v61, %v635_v13 }
 0x133   : > { %v648_v16 = vmul.f32 %v843_v0, %v647_v14 }
 0x134   : > { %v637_v17 = vmul.f32 %v636_v15, %v605_v50 }
 0x135   : > { %v649_v19 = vmul.f32 %v648_v16, %v606_v51 }
 0x136   : > { %v639_v20 = vsel %vm638_vm7, %v605_v50, %v637_v17 }
 0x137   : > { %v642_v22 = vsel %vm640_vm8, %v641_v18, %v639_v20  ;;  %v651_v23 = vsel %vm650_vm9, %v606_v51, %v649_v19 }
 0x138   : > { %v654_v24 = vsel %vm652_vm10, %v653_v21, %v651_v23  ;;  %v659_v25 = vsel %vm655_vm3, %v642_v22, 0.0 }
 0x139   : > { %v660_v26 = vadd.f32 %v659_v25, %v658_v10  ;;  %v661_v27 = vsel %vm655_vm3, %v654_v24, 0.0 }
 0x13b   : > { %v662_v28 = vadd.f32 %v661_v27, %v660_v26 }
 0x13d   : > { %663 = vadd.xlane.f32.xlu0 %v662_v28 }
 0x1b0   : > { %v664_v29 = vpop.xlane.xlu0 %663 }
 0x1b1   : > { %v665_v30 = vrot.slane %v664_v29, 4 }
 0x1b3   : > { %v666_v31 = vadd.f32 %v665_v30, %v664_v29 }
 0x1b5   : > { %v667_v32 = vrot.slane %v666_v31, 2 }
 0x1b7   : > { %v668_v33 = vadd.f32 %v667_v32, %v666_v31 }
 0x1b9   : > { %v669_v34 = vrot.slane %v668_v33, 1 }
 0x1bb   : > { %v670_v35 = vadd.f32 %v669_v34, %v668_v33 }
 0x1bd   : > { %809 = vpush %v670_v35 }
 0x1ee   : > { %s810_s28 = spop %809 }
 0x1ef   : > { %v673_v36 = vstv %s810_s28 }
 0x1f0   : > { %675 = vst [vmem:[%s371_s7] sm:$0xff] %v673_v36 }
 0x1f1 PF: > { %s16_s23 = sadd.s32 1, %s866_s23   ;;  %s983_s21 = smov %s862_s22 }
 0x1f2   : > { %p13_p7 = scmp.ge.s32.totalorder %s16_s23, 4   ;;  %s984_s22 = smov %s986_s24 }
 0x1f4   :  { %15 = sbr.rel (!%p13_p7) target bundleno = 2 (0x2), region = 87 }

</bundles_post_ra>
